<compile_context>
chip_gen: v7x
topology: tpu7x:2x2x1
jax: 0.10.0
libtpu: 0.0.40
codegen_flags: <defaults>
</compile_context>

<pallas_src>
import functools
import math

import jax
import jax.numpy as jnp
from jax.experimental import pallas as pl
from jax.experimental.pallas import tpu as pltpu


# ----------------------------- in-kernel helpers -----------------------------

def _layer_norm(x, gamma, beta, eps=1e-5):
    # PyTorch nn.LayerNorm: biased variance, eps=1e-5
    mu = jnp.mean(x, axis=-1, keepdims=True)
    var = jnp.mean((x - mu) ** 2, axis=-1, keepdims=True)
    return (x - mu) * jax.lax.rsqrt(var + eps) * gamma + beta


# ------------------------------- fused kernel --------------------------------
# One grid step = one batch tile x one encoder layer.

def encoder_kernel(x_ref, mask_ref,
                   wq_ref, bq_ref, wk_ref, bk_ref, wv_ref, bv_ref,
                   wo_ref, bo_ref,
                   ln1_g_ref, ln1_b_ref, ln2_g_ref, ln2_b_ref,
                   w1_ref, b1_ref, w2_ref, b2_ref,
                   o_ref, *, H):
    # On the first layer, load the input activation into the resident output block.
    @pl.when(pl.program_id(1) == 0)
    def _():
        o_ref[...] = x_ref[...]

    x3 = o_ref[...]                       # (TB, S, D) f32, VMEM-resident across layers
    TB, S, D = x3.shape
    dk = D // H
    scale = 1.0 / math.sqrt(dk)
    R = TB * S

    # additive key mask, computed ONCE (not per head)
    mask_bias = jnp.where(mask_ref[...] == 0.0, -1e30, 0.0)      # (TB, 1, S) f32

    x = x3.reshape(R, D)                  # lane-dense (TB*S, D) row slab for the MXU

    # ---- sublayer 0: pre-LN multi-head self-attention + residual ----
    xn = _layer_norm(x, ln1_g_ref[0], ln1_b_ref[0])
    xn_b = xn.astype(jnp.bfloat16)
    q = jnp.dot(xn_b, wq_ref[0], preferred_element_type=jnp.float32) + bq_ref[0]
    k = jnp.dot(xn_b, wk_ref[0], preferred_element_type=jnp.float32) + bk_ref[0]
    v = jnp.dot(xn_b, wv_ref[0], preferred_element_type=jnp.float32) + bv_ref[0]
    q = q * scale                         # fold 1/sqrt(dk) into Q (R*dk muls, not H*S*S)

    q3 = q.reshape(TB, S, D)
    k3 = k.reshape(TB, S, D)
    v3 = v.reshape(TB, S, D)

    # Accumulate the output projection head-by-head through Wo (no concat).
    att = jnp.zeros((R, D), jnp.float32)
    for h in range(H):                    # static, unrolled head loop
        sl = slice(h * dk, (h + 1) * dk)
        qh = q3[:, :, sl].astype(jnp.bfloat16)           # (TB, S, dk)
        kh = k3[:, :, sl].astype(jnp.bfloat16)
        vh = v3[:, :, sl].astype(jnp.bfloat16)
        sc = jnp.einsum('bqd,bkd->bqk', qh, kh,
                        preferred_element_type=jnp.float32) + mask_bias   # (TB,S,S)
        m = jnp.max(sc, axis=-1, keepdims=True)
        e = jnp.exp(sc - m)
        p = e * pl.reciprocal(jnp.sum(e, axis=-1, keepdims=True), approx=True)
        oh = jnp.einsum('bqk,bkd->bqd', p.astype(jnp.bfloat16), vh,
                        preferred_element_type=jnp.float32)               # (TB,S,dk)
        att = att + jnp.dot(oh.reshape(R, dk).astype(jnp.bfloat16),
                            wo_ref[0, h],                                 # (dk, D) bf16
                            preferred_element_type=jnp.float32)
    x = x + att + bo_ref[0]               # residual (dropout skipped)

    # ---- sublayer 1: pre-LN position-wise feed-forward + residual ----
    xn2 = _layer_norm(x, ln2_g_ref[0], ln2_b_ref[0]).astype(jnp.bfloat16)
    hdn = jnp.dot(xn2, w1_ref[0], preferred_element_type=jnp.float32) + b1_ref[0]
    hdn = jnp.maximum(hdn, 0.0).astype(jnp.bfloat16)                      # ReLU
    ff = jnp.dot(hdn, w2_ref[0], preferred_element_type=jnp.float32) + b2_ref[0]
    x = x + ff

    o_ref[...] = x.reshape(TB, S, D)


# --------------------------------- wrappers ----------------------------------

_PARAM_ORDER = ("wq", "bq", "wk", "bk", "wv", "bv", "wo", "bo",
                "ln1_g", "ln1_b", "ln2_g", "ln2_b", "w1", "b1", "w2", "b2")
_BF16 = frozenset({"wq", "wk", "wv", "wo", "w1", "w2"})


def _stack_layer_params(layer_params, H):
    """Stack per-layer params along a leading layer axis.

    Matmul weights are stored in bf16 (halves HBM/VMEM traffic; f32 accumulation
    in-kernel).  Wo is pre-reshaped to (H, dk, D) so the kernel indexes heads on
    leading dims instead of slicing packed bf16 sublanes.
    """
    stacked = {}
    for name in _PARAM_ORDER:
        arr = jnp.stack([p[name] for p in layer_params], axis=0)
        if name == "wo":
            nl, d, _ = arr.shape
            arr = arr.reshape(nl, H, d // H, d)
        if name in _BF16:
            arr = arr.astype(jnp.bfloat16)
        stacked[name] = arr
    return [stacked[n] for n in _PARAM_ORDER]


def encoder_forward(x, mask, layer_params, H, *, batch_tile=None):
    """Encoder.forward: all N EncoderLayers in a single fused pallas_call."""
    B, S, D = x.shape
    NL = len(layer_params)
    TB = B if batch_tile is None else batch_tile
    assert B % TB == 0, "batch_tile must divide batch"
    weights = _stack_layer_params(layer_params, H)

    act_map = lambda b, l: (b, 0, 0)
    in_specs = [pl.BlockSpec((TB, S, D), act_map),      # x
                pl.BlockSpec((TB, 1, S), act_map)]      # src_mask
    for w in weights:
        blk = (1,) + w.shape[1:]
        in_specs.append(
            pl.BlockSpec(blk, lambda b, l, _nd=w.ndim: (l,) + (0,) * (_nd - 1)))
    out_specs = pl.BlockSpec((TB, S, D), act_map)       # same block across layer axis

    kernel = functools.partial(encoder_kernel, H=H)
    return pl.pallas_call(
        kernel,
        out_shape=jax.ShapeDtypeStruct((B, S, D), jnp.float32),
        grid=(B // TB, NL),
        in_specs=in_specs,
        out_specs=out_specs,
        compiler_params=pltpu.CompilerParams(
            dimension_semantics=("parallel", "arbitrary")),
    )(x.astype(jnp.float32), mask.astype(jnp.float32), *weights)


# -------------------------- deterministic param init -------------------------

def init_layer_params(key, d_model, d_ff):
    ks = jax.random.split(key, 12)

    def w(k, shape):
        return (0.02 * jax.random.normal(k, shape, jnp.float32)).astype(jnp.float32)

    return dict(
        wq=w(ks[0], (d_model, d_model)), bq=w(ks[1], (1, d_model)),
        wk=w(ks[2], (d_model, d_model)), bk=w(ks[3], (1, d_model)),
        wv=w(ks[4], (d_model, d_model)), bv=w(ks[5], (1, d_model)),
        wo=w(ks[6], (d_model, d_model)), bo=w(ks[7], (1, d_model)),
        ln1_g=jnp.ones((1, d_model), jnp.float32),
        ln1_b=jnp.zeros((1, d_model), jnp.float32),
        ln2_g=jnp.ones((1, d_model), jnp.float32),
        ln2_b=jnp.zeros((1, d_model), jnp.float32),
        w1=w(ks[8], (d_model, d_ff)), b1=w(ks[9], (1, d_ff)),
        w2=w(ks[10], (d_ff, d_model)), b2=w(ks[11], (1, d_model)),
    )


# ------------------------------ pure-JAX reference ----------------------------

def _ref_layer(x, mask, p, H):
    def ln(t, g, b, eps=1e-5):
        mu = t.mean(-1, keepdims=True)
        var = ((t - mu) ** 2).mean(-1, keepdims=True)
        return (t - mu) / jnp.sqrt(var + eps) * g + b

    B, S, D = x.shape
    dk = D // H
    xn = ln(x, p["ln1_g"][0], p["ln1_b"][0])
    q = (xn @ p["wq"] + p["bq"][0]).reshape(B, S, H, dk).transpose(0, 2, 1, 3)
    k = (xn @ p["wk"] + p["bk"][0]).reshape(B, S, H, dk).transpose(0, 2, 1, 3)
    v = (xn @ p["wv"] + p["bv"][0]).reshape(B, S, H, dk).transpose(0, 2, 1, 3)
    scores = (q @ k.transpose(0, 1, 3, 2)) / math.sqrt(dk)       # (B, H, S, S)
    scores = jnp.where(mask[:, None] == 0.0, -1e30, scores)      # (B,1,1,S) broadcast
    att = jax.nn.softmax(scores, axis=-1) @ v                    # (B, H, S, dk)
    att = att.transpose(0, 2, 1, 3).reshape(B, S, D) @ p["wo"] + p["bo"][0]
    x = x + att
    xn2 = ln(x, p["ln2_g"][0], p["ln2_b"][0])
    ff = jnp.maximum(xn2 @ p["w1"] + p["b1"][0], 0.0) @ p["w2"] + p["b2"][0]
    return x + ff


def _ref_encoder(x, mask, layer_params, H):
    for p in layer_params:
        x = _ref_layer(x, mask, p, H)
    return x


# ----------------------------------- main -------------------------------------

if __name__ == "__main__":
    B, S, d_model, H, d_ff, N = 2, 8, 32, 4, 64, 2  # dout_p irrelevant at inference

    key = jax.random.PRNGKey(0)
    k_x, k_p = jax.random.split(key)
    x = jax.random.normal(k_x, (B, S, d_model), jnp.float32)

    # src_mask: (B, 1, S); batch 1 has its last two positions masked out.
    mask = jnp.ones((B, 1, S), jnp.float32)
    mask = mask.at[1, 0, -2:].set(0.0)

    layer_params = [init_layer_params(k, d_model, d_ff)
                    for k in jax.random.split(k_p, N)]

    out = encoder_forward(x, mask, layer_params, H)
    out = jax.block_until_ready(out)

    ref = _ref_encoder(x, mask, layer_params, H)
    assert out.shape == (B, S, d_model)
    max_err = float(jnp.max(jnp.abs(out - ref)))
    # bf16 matmul operands (f32 accumulation) -> slightly looser tolerance than pure f32
    assert jnp.allclose(out, ref, atol=5e-3, rtol=5e-3), \
        f"mismatch vs JAX reference (max abs err {max_err:.3e})"

    print("KERNEL_OK")
</pallas_src>

<mosaic_0001>
module attributes {stable_mosaic.version = 11 : i64} {
  func.func @encoder_kernel(%arg0: i32, %arg1: i32, %arg2: memref<2x8x32xf32, #tpu.memory_space<vmem>>, %arg3: memref<2x1x8xf32, #tpu.memory_space<vmem>>, %arg4: memref<1x32x32xbf16, #tpu.memory_space<vmem>>, %arg5: memref<1x1x32xf32, #tpu.memory_space<vmem>>, %arg6: memref<1x32x32xbf16, #tpu.memory_space<vmem>>, %arg7: memref<1x1x32xf32, #tpu.memory_space<vmem>>, %arg8: memref<1x32x32xbf16, #tpu.memory_space<vmem>>, %arg9: memref<1x1x32xf32, #tpu.memory_space<vmem>>, %arg10: memref<1x4x8x32xbf16, #tpu.memory_space<vmem>>, %arg11: memref<1x1x32xf32, #tpu.memory_space<vmem>>, %arg12: memref<1x1x32xf32, #tpu.memory_space<vmem>>, %arg13: memref<1x1x32xf32, #tpu.memory_space<vmem>>, %arg14: memref<1x1x32xf32, #tpu.memory_space<vmem>>, %arg15: memref<1x1x32xf32, #tpu.memory_space<vmem>>, %arg16: memref<1x32x64xbf16, #tpu.memory_space<vmem>>, %arg17: memref<1x1x64xf32, #tpu.memory_space<vmem>>, %arg18: memref<1x64x32xbf16, #tpu.memory_space<vmem>>, %arg19: memref<1x1x32xf32, #tpu.memory_space<vmem>>, %arg20: memref<2x8x32xf32, #tpu.memory_space<vmem>>) attributes {dimension_semantics = [#tpu.dimension_semantics<parallel>, #tpu.dimension_semantics<arbitrary>], iteration_bounds = array<i64: 1, 2>, scalar_prefetch = 0 : i64, scratch_operands = 0 : i64, tpu.core_type = #tpu.core_type<tc>, window_params = [{transform_indices = @transform_0, window_bounds = array<i64: 2, 8, 32>}, {transform_indices = @transform_1, window_bounds = array<i64: 2, 1, 8>}, {transform_indices = @transform_2, window_bounds = array<i64: 1, 32, 32>}, {transform_indices = @transform_3, window_bounds = array<i64: 1, 1, 32>}, {transform_indices = @transform_4, window_bounds = array<i64: 1, 32, 32>}, {transform_indices = @transform_5, window_bounds = array<i64: 1, 1, 32>}, {transform_indices = @transform_6, window_bounds = array<i64: 1, 32, 32>}, {transform_indices = @transform_7, window_bounds = array<i64: 1, 1, 32>}, {transform_indices = @transform_8, window_bounds = array<i64: 1, 4, 8, 32>}, {transform_indices = @transform_9, window_bounds = array<i64: 1, 1, 32>}, {transform_indices = @transform_10, window_bounds = array<i64: 1, 1, 32>}, {transform_indices = @transform_11, window_bounds = array<i64: 1, 1, 32>}, {transform_indices = @transform_12, window_bounds = array<i64: 1, 1, 32>}, {transform_indices = @transform_13, window_bounds = array<i64: 1, 1, 32>}, {transform_indices = @transform_14, window_bounds = array<i64: 1, 32, 64>}, {transform_indices = @transform_15, window_bounds = array<i64: 1, 1, 64>}, {transform_indices = @transform_16, window_bounds = array<i64: 1, 64, 32>}, {transform_indices = @transform_17, window_bounds = array<i64: 1, 1, 32>}, {transform_indices = @transform_18, window_bounds = array<i64: 2, 8, 32>}]} {
    %c0_i32 = arith.constant 0 : i32
    %0 = arith.cmpi eq, %arg1, %c0_i32 : i32
    %1 = arith.extui %0 : i1 to i32
    %c0_i32_0 = arith.constant 0 : i32
    %2 = arith.cmpi ne, %1, %c0_i32_0 : i32
    scf.if %2 {
      %c0_107 = arith.constant 0 : index
      %c0_108 = arith.constant 0 : index
      %c0_109 = arith.constant 0 : index
      %225 = vector.load %arg2[%c0_107, %c0_108, %c0_109] : memref<2x8x32xf32, #tpu.memory_space<vmem>>, vector<2x8x32xf32>
      %c0_110 = arith.constant 0 : index
      %c0_111 = arith.constant 0 : index
      %c0_112 = arith.constant 0 : index
      %226 = vector.load %arg20[%c0_110, %c0_111, %c0_112] : memref<2x8x32xf32, #tpu.memory_space<vmem>>, vector<2x8x32xf32>
      tpu.vector_store %arg20[%c0_110, %c0_111, %c0_112], %225 {strides = array<i32>} : memref<2x8x32xf32, #tpu.memory_space<vmem>>, vector<2x8x32xf32>,
    } else {
    }
    %c0 = arith.constant 0 : index
    %c0_1 = arith.constant 0 : index
    %c0_2 = arith.constant 0 : index
    %3 = vector.load %arg20[%c0, %c0_1, %c0_2] : memref<2x8x32xf32, #tpu.memory_space<vmem>>, vector<2x8x32xf32>
    %c0_3 = arith.constant 0 : index
    %c0_4 = arith.constant 0 : index
    %c0_5 = arith.constant 0 : index
    %4 = vector.load %arg3[%c0_3, %c0_4, %c0_5] : memref<2x1x8xf32, #tpu.memory_space<vmem>>, vector<2x1x8xf32>
    %cst = arith.constant 0.000000e+00 : f32
    %5 = vector.broadcast %cst : f32 to vector<2x1x8xf32>
    %6 = arith.cmpf oeq, %4, %5 : vector<2x1x8xf32>
    %cst_6 = arith.constant -1.000000e+30 : f32
    %cst_7 = arith.constant 0.000000e+00 : f32
    %7 = vector.broadcast %cst_6 : f32 to vector<2x1x8xf32>
    %8 = vector.broadcast %cst_7 : f32 to vector<2x1x8xf32>
    %9 = arith.select %6, %7, %8 : vector<2x1x8xi1>, vector<2x1x8xf32>
    %10 = vector.shape_cast %3 : vector<2x8x32xf32> to vector<16x32xf32>
    %c0_8 = arith.constant 0 : index
    %c0_9 = arith.constant 0 : index
    %c0_10 = arith.constant 0 : index
    %11 = vector.load %arg12[%c0_8, %c0_9, %c0_10] : memref<1x1x32xf32, #tpu.memory_space<vmem>>, vector<1x1x32xf32>
    %12 = vector.shape_cast %11 : vector<1x1x32xf32> to vector<1x32xf32>
    %c0_11 = arith.constant 0 : index
    %c0_12 = arith.constant 0 : index
    %c0_13 = arith.constant 0 : index
    %13 = vector.load %arg13[%c0_11, %c0_12, %c0_13] : memref<1x1x32xf32, #tpu.memory_space<vmem>>, vector<1x1x32xf32>
    %14 = vector.shape_cast %13 : vector<1x1x32xf32> to vector<1x32xf32>
    %cst_14 = arith.constant dense<0.000000e+00> : vector<16xf32>
    %15 = vector.multi_reduction <add>, %10, %cst_14 [1] : vector<16x32xf32> to vector<16xf32>
    %16 = vector.shape_cast %15 : vector<16xf32> to vector<16x1xf32>
    %cst_15 = arith.constant 3.200000e+01 : f32
    %17 = vector.broadcast %cst_15 : f32 to vector<16x1xf32>
    %18 = arith.divf %16, %17 : vector<16x1xf32>
    %19 = vector.broadcast %18 : vector<16x1xf32> to vector<16x32xf32>
    %20 = arith.subf %10, %19 : vector<16x32xf32>
    %21 = arith.mulf %20, %20 : vector<16x32xf32>
    %cst_16 = arith.constant dense<0.000000e+00> : vector<16xf32>
    %22 = vector.multi_reduction <add>, %21, %cst_16 [1] : vector<16x32xf32> to vector<16xf32>
    %23 = vector.shape_cast %22 : vector<16xf32> to vector<16x1xf32>
    %cst_17 = arith.constant 3.200000e+01 : f32
    %24 = vector.broadcast %cst_17 : f32 to vector<16x1xf32>
    %25 = arith.divf %23, %24 : vector<16x1xf32>
    %26 = vector.broadcast %18 : vector<16x1xf32> to vector<16x32xf32>
    %27 = arith.subf %10, %26 : vector<16x32xf32>
    %cst_18 = arith.constant 9.99999974E-6 : f32
    %28 = vector.broadcast %cst_18 : f32 to vector<16x1xf32>
    %29 = arith.addf %25, %28 : vector<16x1xf32>
    %30 = math.rsqrt %29 : vector<16x1xf32>
    %31 = vector.broadcast %30 : vector<16x1xf32> to vector<16x32xf32>
    %32 = arith.mulf %27, %31 : vector<16x32xf32>
    %33 = vector.broadcast %12 : vector<1x32xf32> to vector<16x32xf32>
    %34 = arith.mulf %32, %33 : vector<16x32xf32>
    %35 = vector.broadcast %14 : vector<1x32xf32> to vector<16x32xf32>
    %36 = arith.addf %34, %35 : vector<16x32xf32>
    %37 = arith.truncf %36 : vector<16x32xf32> to vector<16x32xbf16>
    %c0_19 = arith.constant 0 : index
    %c0_20 = arith.constant 0 : index
    %c0_21 = arith.constant 0 : index
    %38 = vector.load %arg4[%c0_19, %c0_20, %c0_21] : memref<1x32x32xbf16, #tpu.memory_space<vmem>>, vector<1x32x32xbf16>
    %39 = vector.shape_cast %38 : vector<1x32x32xbf16> to vector<32x32xbf16>
    %cst_22 = arith.constant dense<0.000000e+00> : vector<16x32xf32>
    %40 = tpu.matmul %37, %39, %cst_22 {dimension_numbers = #tpu.dot_dimension_numbers<[1], [0], [0], [1], [0, 0, 1, 1], [], []>} : vector<16x32xbf16>, vector<32x32xbf16>, vector<16x32xf32> -> vector<16x32xf32>
    %c0_23 = arith.constant 0 : index
    %c0_24 = arith.constant 0 : index
    %c0_25 = arith.constant 0 : index
    %41 = vector.load %arg5[%c0_23, %c0_24, %c0_25] : memref<1x1x32xf32, #tpu.memory_space<vmem>>, vector<1x1x32xf32>
    %42 = vector.shape_cast %41 : vector<1x1x32xf32> to vector<1x32xf32>
    %43 = vector.broadcast %42 : vector<1x32xf32> to vector<16x32xf32>
    %44 = arith.addf %40, %43 : vector<16x32xf32>
    %c0_26 = arith.constant 0 : index
    %c0_27 = arith.constant 0 : index
    %c0_28 = arith.constant 0 : index
    %45 = vector.load %arg6[%c0_26, %c0_27, %c0_28] : memref<1x32x32xbf16, #tpu.memory_space<vmem>>, vector<1x32x32xbf16>
    %46 = vector.shape_cast %45 : vector<1x32x32xbf16> to vector<32x32xbf16>
    %cst_29 = arith.constant dense<0.000000e+00> : vector<16x32xf32>
    %47 = tpu.matmul %37, %46, %cst_29 {dimension_numbers = #tpu.dot_dimension_numbers<[1], [0], [0], [1], [0, 0, 1, 1], [], []>} : vector<16x32xbf16>, vector<32x32xbf16>, vector<16x32xf32> -> vector<16x32xf32>
    %c0_30 = arith.constant 0 : index
    %c0_31 = arith.constant 0 : index
    %c0_32 = arith.constant 0 : index
    %48 = vector.load %arg7[%c0_30, %c0_31, %c0_32] : memref<1x1x32xf32, #tpu.memory_space<vmem>>, vector<1x1x32xf32>
    %49 = vector.shape_cast %48 : vector<1x1x32xf32> to vector<1x32xf32>
    %50 = vector.broadcast %49 : vector<1x32xf32> to vector<16x32xf32>
    %51 = arith.addf %47, %50 : vector<16x32xf32>
    %c0_33 = arith.constant 0 : index
    %c0_34 = arith.constant 0 : index
    %c0_35 = arith.constant 0 : index
    %52 = vector.load %arg8[%c0_33, %c0_34, %c0_35] : memref<1x32x32xbf16, #tpu.memory_space<vmem>>, vector<1x32x32xbf16>
    %53 = vector.shape_cast %52 : vector<1x32x32xbf16> to vector<32x32xbf16>
    %cst_36 = arith.constant dense<0.000000e+00> : vector<16x32xf32>
    %54 = tpu.matmul %37, %53, %cst_36 {dimension_numbers = #tpu.dot_dimension_numbers<[1], [0], [0], [1], [0, 0, 1, 1], [], []>} : vector<16x32xbf16>, vector<32x32xbf16>, vector<16x32xf32> -> vector<16x32xf32>
    %c0_37 = arith.constant 0 : index
    %c0_38 = arith.constant 0 : index
    %c0_39 = arith.constant 0 : index
    %55 = vector.load %arg9[%c0_37, %c0_38, %c0_39] : memref<1x1x32xf32, #tpu.memory_space<vmem>>, vector<1x1x32xf32>
    %56 = vector.shape_cast %55 : vector<1x1x32xf32> to vector<1x32xf32>
    %57 = vector.broadcast %56 : vector<1x32xf32> to vector<16x32xf32>
    %58 = arith.addf %54, %57 : vector<16x32xf32>
    %cst_40 = arith.constant 0.353553385 : f32
    %59 = vector.broadcast %cst_40 : f32 to vector<16x32xf32>
    %60 = arith.mulf %44, %59 : vector<16x32xf32>
    %61 = vector.shape_cast %60 : vector<16x32xf32> to vector<2x8x32xf32>
    %62 = vector.shape_cast %51 : vector<16x32xf32> to vector<2x8x32xf32>
    %63 = vector.shape_cast %58 : vector<16x32xf32> to vector<2x8x32xf32>
    %cst_41 = arith.constant 0.000000e+00 : f32
    %64 = vector.broadcast %cst_41 : f32 to vector<16x32xf32>
    %65 = vector.extract_strided_slice %61 {offsets = [0, 0, 0], sizes = [2, 8, 8], strides = [1, 1, 1]} : vector<2x8x32xf32> to vector<2x8x8xf32>
    %66 = arith.truncf %65 : vector<2x8x8xf32> to vector<2x8x8xbf16>
    %67 = vector.extract_strided_slice %62 {offsets = [0, 0, 0], sizes = [2, 8, 8], strides = [1, 1, 1]} : vector<2x8x32xf32> to vector<2x8x8xf32>
    %68 = arith.truncf %67 : vector<2x8x8xf32> to vector<2x8x8xbf16>
    %69 = vector.extract_strided_slice %63 {offsets = [0, 0, 0], sizes = [2, 8, 8], strides = [1, 1, 1]} : vector<2x8x32xf32> to vector<2x8x8xf32>
    %70 = arith.truncf %69 : vector<2x8x8xf32> to vector<2x8x8xbf16>
    "tpu.trace_start"() <{level = 10 : i32, message = "bqd,bkd->bqk"}> : () -> ()
    %cst_42 = arith.constant dense<0.000000e+00> : vector<2x8x8xf32>
    %71 = tpu.matmul %66, %68, %cst_42 {dimension_numbers = #tpu.dot_dimension_numbers<[2], [2], [1], [1], [0, 0, 0, 1, 1, 1], [0], [0]>} : vector<2x8x8xbf16>, vector<2x8x8xbf16>, vector<2x8x8xf32> -> vector<2x8x8xf32>
    "tpu.trace_stop"() : () -> ()
    %72 = vector.broadcast %9 : vector<2x1x8xf32> to vector<2x8x8xf32>
    %73 = arith.addf %71, %72 : vector<2x8x8xf32>
    %cst_43 = arith.constant dense<0xFF800000> : vector<2x8xf32>
    %74 = vector.multi_reduction <maximumf>, %73, %cst_43 [2] : vector<2x8x8xf32> to vector<2x8xf32>
    %75 = vector.shape_cast %74 : vector<2x8xf32> to vector<2x8x1xf32>
    %76 = vector.broadcast %75 : vector<2x8x1xf32> to vector<2x8x8xf32>
    %77 = arith.subf %73, %76 : vector<2x8x8xf32>
    %78 = math.exp %77 : vector<2x8x8xf32>
    %cst_44 = arith.constant dense<0.000000e+00> : vector<2x8xf32>
    %79 = vector.multi_reduction <add>, %78, %cst_44 [2] : vector<2x8x8xf32> to vector<2x8xf32>
    %80 = vector.shape_cast %79 : vector<2x8xf32> to vector<2x8x1xf32>
    %81 = tpu.reciprocal %80 {approx = true} : vector<2x8x1xf32> -> vector<2x8x1xf32>
    %82 = vector.broadcast %81 : vector<2x8x1xf32> to vector<2x8x8xf32>
    %83 = arith.mulf %78, %82 : vector<2x8x8xf32>
    %84 = arith.truncf %83 : vector<2x8x8xf32> to vector<2x8x8xbf16>
    "tpu.trace_start"() <{level = 10 : i32, message = "bqk,bkd->bqd"}> : () -> ()
    %cst_45 = arith.constant dense<0.000000e+00> : vector<2x8x8xf32>
    %85 = tpu.matmul %84, %70, %cst_45 {dimension_numbers = #tpu.dot_dimension_numbers<[2], [1], [1], [2], [0, 0, 0, 1, 1, 2], [0], [0]>} : vector<2x8x8xbf16>, vector<2x8x8xbf16>, vector<2x8x8xf32> -> vector<2x8x8xf32>
    "tpu.trace_stop"() : () -> ()
    %86 = vector.shape_cast %85 : vector<2x8x8xf32> to vector<16x8xf32>
    %87 = arith.truncf %86 : vector<16x8xf32> to vector<16x8xbf16>
    %c0_46 = arith.constant 0 : index
    %c0_47 = arith.constant 0 : index
    %c0_48 = arith.constant 0 : index
    %c0_49 = arith.constant 0 : index
    %88 = vector.load %arg10[%c0_46, %c0_47, %c0_48, %c0_49] : memref<1x4x8x32xbf16, #tpu.memory_space<vmem>>, vector<1x1x8x32xbf16>
    %89 = vector.shape_cast %88 : vector<1x1x8x32xbf16> to vector<8x32xbf16>
    %cst_50 = arith.constant dense<0.000000e+00> : vector<16x32xf32>
    %90 = tpu.matmul %87, %89, %cst_50 {dimension_numbers = #tpu.dot_dimension_numbers<[1], [0], [0], [1], [0, 0, 1, 1], [], []>} : vector<16x8xbf16>, vector<8x32xbf16>, vector<16x32xf32> -> vector<16x32xf32>
    %91 = arith.addf %64, %90 : vector<16x32xf32>
    %92 = vector.extract_strided_slice %61 {offsets = [0, 0, 8], sizes = [2, 8, 8], strides = [1, 1, 1]} : vector<2x8x32xf32> to vector<2x8x8xf32>
    %93 = arith.truncf %92 : vector<2x8x8xf32> to vector<2x8x8xbf16>
    %94 = vector.extract_strided_slice %62 {offsets = [0, 0, 8], sizes = [2, 8, 8], strides = [1, 1, 1]} : vector<2x8x32xf32> to vector<2x8x8xf32>
    %95 = arith.truncf %94 : vector<2x8x8xf32> to vector<2x8x8xbf16>
    %96 = vector.extract_strided_slice %63 {offsets = [0, 0, 8], sizes = [2, 8, 8], strides = [1, 1, 1]} : vector<2x8x32xf32> to vector<2x8x8xf32>
    %97 = arith.truncf %96 : vector<2x8x8xf32> to vector<2x8x8xbf16>
    "tpu.trace_start"() <{level = 10 : i32, message = "bqd,bkd->bqk"}> : () -> ()
    %cst_51 = arith.constant dense<0.000000e+00> : vector<2x8x8xf32>
    %98 = tpu.matmul %93, %95, %cst_51 {dimension_numbers = #tpu.dot_dimension_numbers<[2], [2], [1], [1], [0, 0, 0, 1, 1, 1], [0], [0]>} : vector<2x8x8xbf16>, vector<2x8x8xbf16>, vector<2x8x8xf32> -> vector<2x8x8xf32>
    "tpu.trace_stop"() : () -> ()
    %99 = vector.broadcast %9 : vector<2x1x8xf32> to vector<2x8x8xf32>
    %100 = arith.addf %98, %99 : vector<2x8x8xf32>
    %cst_52 = arith.constant dense<0xFF800000> : vector<2x8xf32>
    %101 = vector.multi_reduction <maximumf>, %100, %cst_52 [2] : vector<2x8x8xf32> to vector<2x8xf32>
    %102 = vector.shape_cast %101 : vector<2x8xf32> to vector<2x8x1xf32>
    %103 = vector.broadcast %102 : vector<2x8x1xf32> to vector<2x8x8xf32>
    %104 = arith.subf %100, %103 : vector<2x8x8xf32>
    %105 = math.exp %104 : vector<2x8x8xf32>
    %cst_53 = arith.constant dense<0.000000e+00> : vector<2x8xf32>
    %106 = vector.multi_reduction <add>, %105, %cst_53 [2] : vector<2x8x8xf32> to vector<2x8xf32>
    %107 = vector.shape_cast %106 : vector<2x8xf32> to vector<2x8x1xf32>
    %108 = tpu.reciprocal %107 {approx = true} : vector<2x8x1xf32> -> vector<2x8x1xf32>
    %109 = vector.broadcast %108 : vector<2x8x1xf32> to vector<2x8x8xf32>
    %110 = arith.mulf %105, %109 : vector<2x8x8xf32>
    %111 = arith.truncf %110 : vector<2x8x8xf32> to vector<2x8x8xbf16>
    "tpu.trace_start"() <{level = 10 : i32, message = "bqk,bkd->bqd"}> : () -> ()
    %cst_54 = arith.constant dense<0.000000e+00> : vector<2x8x8xf32>
    %112 = tpu.matmul %111, %97, %cst_54 {dimension_numbers = #tpu.dot_dimension_numbers<[2], [1], [1], [2], [0, 0, 0, 1, 1, 2], [0], [0]>} : vector<2x8x8xbf16>, vector<2x8x8xbf16>, vector<2x8x8xf32> -> vector<2x8x8xf32>
    "tpu.trace_stop"() : () -> ()
    %113 = vector.shape_cast %112 : vector<2x8x8xf32> to vector<16x8xf32>
    %114 = arith.truncf %113 : vector<16x8xf32> to vector<16x8xbf16>
    %c0_55 = arith.constant 0 : index
    %c1 = arith.constant 1 : index
    %c0_56 = arith.constant 0 : index
    %c0_57 = arith.constant 0 : index
    %115 = vector.load %arg10[%c0_55, %c1, %c0_56, %c0_57] : memref<1x4x8x32xbf16, #tpu.memory_space<vmem>>, vector<1x1x8x32xbf16>
    %116 = vector.shape_cast %115 : vector<1x1x8x32xbf16> to vector<8x32xbf16>
    %cst_58 = arith.constant dense<0.000000e+00> : vector<16x32xf32>
    %117 = tpu.matmul %114, %116, %cst_58 {dimension_numbers = #tpu.dot_dimension_numbers<[1], [0], [0], [1], [0, 0, 1, 1], [], []>} : vector<16x8xbf16>, vector<8x32xbf16>, vector<16x32xf32> -> vector<16x32xf32>
    %118 = arith.addf %91, %117 : vector<16x32xf32>
    %119 = vector.extract_strided_slice %61 {offsets = [0, 0, 16], sizes = [2, 8, 8], strides = [1, 1, 1]} : vector<2x8x32xf32> to vector<2x8x8xf32>
    %120 = arith.truncf %119 : vector<2x8x8xf32> to vector<2x8x8xbf16>
    %121 = vector.extract_strided_slice %62 {offsets = [0, 0, 16], sizes = [2, 8, 8], strides = [1, 1, 1]} : vector<2x8x32xf32> to vector<2x8x8xf32>
    %122 = arith.truncf %121 : vector<2x8x8xf32> to vector<2x8x8xbf16>
    %123 = vector.extract_strided_slice %63 {offsets = [0, 0, 16], sizes = [2, 8, 8], strides = [1, 1, 1]} : vector<2x8x32xf32> to vector<2x8x8xf32>
    %124 = arith.truncf %123 : vector<2x8x8xf32> to vector<2x8x8xbf16>
    "tpu.trace_start"() <{level = 10 : i32, message = "bqd,bkd->bqk"}> : () -> ()
    %cst_59 = arith.constant dense<0.000000e+00> : vector<2x8x8xf32>
    %125 = tpu.matmul %120, %122, %cst_59 {dimension_numbers = #tpu.dot_dimension_numbers<[2], [2], [1], [1], [0, 0, 0, 1, 1, 1], [0], [0]>} : vector<2x8x8xbf16>, vector<2x8x8xbf16>, vector<2x8x8xf32> -> vector<2x8x8xf32>
    "tpu.trace_stop"() : () -> ()
    %126 = vector.broadcast %9 : vector<2x1x8xf32> to vector<2x8x8xf32>
    %127 = arith.addf %125, %126 : vector<2x8x8xf32>
    %cst_60 = arith.constant dense<0xFF800000> : vector<2x8xf32>
    %128 = vector.multi_reduction <maximumf>, %127, %cst_60 [2] : vector<2x8x8xf32> to vector<2x8xf32>
    %129 = vector.shape_cast %128 : vector<2x8xf32> to vector<2x8x1xf32>
    %130 = vector.broadcast %129 : vector<2x8x1xf32> to vector<2x8x8xf32>
    %131 = arith.subf %127, %130 : vector<2x8x8xf32>
    %132 = math.exp %131 : vector<2x8x8xf32>
    %cst_61 = arith.constant dense<0.000000e+00> : vector<2x8xf32>
    %133 = vector.multi_reduction <add>, %132, %cst_61 [2] : vector<2x8x8xf32> to vector<2x8xf32>
    %134 = vector.shape_cast %133 : vector<2x8xf32> to vector<2x8x1xf32>
    %135 = tpu.reciprocal %134 {approx = true} : vector<2x8x1xf32> -> vector<2x8x1xf32>
    %136 = vector.broadcast %135 : vector<2x8x1xf32> to vector<2x8x8xf32>
    %137 = arith.mulf %132, %136 : vector<2x8x8xf32>
    %138 = arith.truncf %137 : vector<2x8x8xf32> to vector<2x8x8xbf16>
    "tpu.trace_start"() <{level = 10 : i32, message = "bqk,bkd->bqd"}> : () -> ()
    %cst_62 = arith.constant dense<0.000000e+00> : vector<2x8x8xf32>
    %139 = tpu.matmul %138, %124, %cst_62 {dimension_numbers = #tpu.dot_dimension_numbers<[2], [1], [1], [2], [0, 0, 0, 1, 1, 2], [0], [0]>} : vector<2x8x8xbf16>, vector<2x8x8xbf16>, vector<2x8x8xf32> -> vector<2x8x8xf32>
    "tpu.trace_stop"() : () -> ()
    %140 = vector.shape_cast %139 : vector<2x8x8xf32> to vector<16x8xf32>
    %141 = arith.truncf %140 : vector<16x8xf32> to vector<16x8xbf16>
    %c0_63 = arith.constant 0 : index
    %c2 = arith.constant 2 : index
    %c0_64 = arith.constant 0 : index
    %c0_65 = arith.constant 0 : index
    %142 = vector.load %arg10[%c0_63, %c2, %c0_64, %c0_65] : memref<1x4x8x32xbf16, #tpu.memory_space<vmem>>, vector<1x1x8x32xbf16>
    %143 = vector.shape_cast %142 : vector<1x1x8x32xbf16> to vector<8x32xbf16>
    %cst_66 = arith.constant dense<0.000000e+00> : vector<16x32xf32>
    %144 = tpu.matmul %141, %143, %cst_66 {dimension_numbers = #tpu.dot_dimension_numbers<[1], [0], [0], [1], [0, 0, 1, 1], [], []>} : vector<16x8xbf16>, vector<8x32xbf16>, vector<16x32xf32> -> vector<16x32xf32>
    %145 = arith.addf %118, %144 : vector<16x32xf32>
    %146 = vector.extract_strided_slice %61 {offsets = [0, 0, 24], sizes = [2, 8, 8], strides = [1, 1, 1]} : vector<2x8x32xf32> to vector<2x8x8xf32>
    %147 = arith.truncf %146 : vector<2x8x8xf32> to vector<2x8x8xbf16>
    %148 = vector.extract_strided_slice %62 {offsets = [0, 0, 24], sizes = [2, 8, 8], strides = [1, 1, 1]} : vector<2x8x32xf32> to vector<2x8x8xf32>
    %149 = arith.truncf %148 : vector<2x8x8xf32> to vector<2x8x8xbf16>
    %150 = vector.extract_strided_slice %63 {offsets = [0, 0, 24], sizes = [2, 8, 8], strides = [1, 1, 1]} : vector<2x8x32xf32> to vector<2x8x8xf32>
    %151 = arith.truncf %150 : vector<2x8x8xf32> to vector<2x8x8xbf16>
    "tpu.trace_start"() <{level = 10 : i32, message = "bqd,bkd->bqk"}> : () -> ()
    %cst_67 = arith.constant dense<0.000000e+00> : vector<2x8x8xf32>
    %152 = tpu.matmul %147, %149, %cst_67 {dimension_numbers = #tpu.dot_dimension_numbers<[2], [2], [1], [1], [0, 0, 0, 1, 1, 1], [0], [0]>} : vector<2x8x8xbf16>, vector<2x8x8xbf16>, vector<2x8x8xf32> -> vector<2x8x8xf32>
    "tpu.trace_stop"() : () -> ()
    %153 = vector.broadcast %9 : vector<2x1x8xf32> to vector<2x8x8xf32>
    %154 = arith.addf %152, %153 : vector<2x8x8xf32>
    %cst_68 = arith.constant dense<0xFF800000> : vector<2x8xf32>
    %155 = vector.multi_reduction <maximumf>, %154, %cst_68 [2] : vector<2x8x8xf32> to vector<2x8xf32>
    %156 = vector.shape_cast %155 : vector<2x8xf32> to vector<2x8x1xf32>
    %157 = vector.broadcast %156 : vector<2x8x1xf32> to vector<2x8x8xf32>
    %158 = arith.subf %154, %157 : vector<2x8x8xf32>
    %159 = math.exp %158 : vector<2x8x8xf32>
    %cst_69 = arith.constant dense<0.000000e+00> : vector<2x8xf32>
    %160 = vector.multi_reduction <add>, %159, %cst_69 [2] : vector<2x8x8xf32> to vector<2x8xf32>
    %161 = vector.shape_cast %160 : vector<2x8xf32> to vector<2x8x1xf32>
    %162 = tpu.reciprocal %161 {approx = true} : vector<2x8x1xf32> -> vector<2x8x1xf32>
    %163 = vector.broadcast %162 : vector<2x8x1xf32> to vector<2x8x8xf32>
    %164 = arith.mulf %159, %163 : vector<2x8x8xf32>
    %165 = arith.truncf %164 : vector<2x8x8xf32> to vector<2x8x8xbf16>
    "tpu.trace_start"() <{level = 10 : i32, message = "bqk,bkd->bqd"}> : () -> ()
    %cst_70 = arith.constant dense<0.000000e+00> : vector<2x8x8xf32>
    %166 = tpu.matmul %165, %151, %cst_70 {dimension_numbers = #tpu.dot_dimension_numbers<[2], [1], [1], [2], [0, 0, 0, 1, 1, 2], [0], [0]>} : vector<2x8x8xbf16>, vector<2x8x8xbf16>, vector<2x8x8xf32> -> vector<2x8x8xf32>
    "tpu.trace_stop"() : () -> ()
    %167 = vector.shape_cast %166 : vector<2x8x8xf32> to vector<16x8xf32>
    %168 = arith.truncf %167 : vector<16x8xf32> to vector<16x8xbf16>
    %c0_71 = arith.constant 0 : index
    %c3 = arith.constant 3 : index
    %c0_72 = arith.constant 0 : index
    %c0_73 = arith.constant 0 : index
    %169 = vector.load %arg10[%c0_71, %c3, %c0_72, %c0_73] : memref<1x4x8x32xbf16, #tpu.memory_space<vmem>>, vector<1x1x8x32xbf16>
    %170 = vector.shape_cast %169 : vector<1x1x8x32xbf16> to vector<8x32xbf16>
    %cst_74 = arith.constant dense<0.000000e+00> : vector<16x32xf32>
    %171 = tpu.matmul %168, %170, %cst_74 {dimension_numbers = #tpu.dot_dimension_numbers<[1], [0], [0], [1], [0, 0, 1, 1], [], []>} : vector<16x8xbf16>, vector<8x32xbf16>, vector<16x32xf32> -> vector<16x32xf32>
    %172 = arith.addf %145, %171 : vector<16x32xf32>
    %173 = arith.addf %10, %172 : vector<16x32xf32>
    %c0_75 = arith.constant 0 : index
    %c0_76 = arith.constant 0 : index
    %c0_77 = arith.constant 0 : index
    %174 = vector.load %arg11[%c0_75, %c0_76, %c0_77] : memref<1x1x32xf32, #tpu.memory_space<vmem>>, vector<1x1x32xf32>
    %175 = vector.shape_cast %174 : vector<1x1x32xf32> to vector<1x32xf32>
    %176 = vector.broadcast %175 : vector<1x32xf32> to vector<16x32xf32>
    %177 = arith.addf %173, %176 : vector<16x32xf32>
    %c0_78 = arith.constant 0 : index
    %c0_79 = arith.constant 0 : index
    %c0_80 = arith.constant 0 : index
    %178 = vector.load %arg14[%c0_78, %c0_79, %c0_80] : memref<1x1x32xf32, #tpu.memory_space<vmem>>, vector<1x1x32xf32>
    %179 = vector.shape_cast %178 : vector<1x1x32xf32> to vector<1x32xf32>
    %c0_81 = arith.constant 0 : index
    %c0_82 = arith.constant 0 : index
    %c0_83 = arith.constant 0 : index
    %180 = vector.load %arg15[%c0_81, %c0_82, %c0_83] : memref<1x1x32xf32, #tpu.memory_space<vmem>>, vector<1x1x32xf32>
    %181 = vector.shape_cast %180 : vector<1x1x32xf32> to vector<1x32xf32>
    %cst_84 = arith.constant dense<0.000000e+00> : vector<16xf32>
    %182 = vector.multi_reduction <add>, %177, %cst_84 [1] : vector<16x32xf32> to vector<16xf32>
    %183 = vector.shape_cast %182 : vector<16xf32> to vector<16x1xf32>
    %cst_85 = arith.constant 3.200000e+01 : f32
    %184 = vector.broadcast %cst_85 : f32 to vector<16x1xf32>
    %185 = arith.divf %183, %184 : vector<16x1xf32>
    %186 = vector.broadcast %185 : vector<16x1xf32> to vector<16x32xf32>
    %187 = arith.subf %177, %186 : vector<16x32xf32>
    %188 = arith.mulf %187, %187 : vector<16x32xf32>
    %cst_86 = arith.constant dense<0.000000e+00> : vector<16xf32>
    %189 = vector.multi_reduction <add>, %188, %cst_86 [1] : vector<16x32xf32> to vector<16xf32>
    %190 = vector.shape_cast %189 : vector<16xf32> to vector<16x1xf32>
    %cst_87 = arith.constant 3.200000e+01 : f32
    %191 = vector.broadcast %cst_87 : f32 to vector<16x1xf32>
    %192 = arith.divf %190, %191 : vector<16x1xf32>
    %193 = vector.broadcast %185 : vector<16x1xf32> to vector<16x32xf32>
    %194 = arith.subf %177, %193 : vector<16x32xf32>
    %cst_88 = arith.constant 9.99999974E-6 : f32
    %195 = vector.broadcast %cst_88 : f32 to vector<16x1xf32>
    %196 = arith.addf %192, %195 : vector<16x1xf32>
    %197 = math.rsqrt %196 : vector<16x1xf32>
    %198 = vector.broadcast %197 : vector<16x1xf32> to vector<16x32xf32>
    %199 = arith.mulf %194, %198 : vector<16x32xf32>
    %200 = vector.broadcast %179 : vector<1x32xf32> to vector<16x32xf32>
    %201 = arith.mulf %199, %200 : vector<16x32xf32>
    %202 = vector.broadcast %181 : vector<1x32xf32> to vector<16x32xf32>
    %203 = arith.addf %201, %202 : vector<16x32xf32>
    %204 = arith.truncf %203 : vector<16x32xf32> to vector<16x32xbf16>
    %c0_89 = arith.constant 0 : index
    %c0_90 = arith.constant 0 : index
    %c0_91 = arith.constant 0 : index
    %205 = vector.load %arg16[%c0_89, %c0_90, %c0_91] : memref<1x32x64xbf16, #tpu.memory_space<vmem>>, vector<1x32x64xbf16>
    %206 = vector.shape_cast %205 : vector<1x32x64xbf16> to vector<32x64xbf16>
    %cst_92 = arith.constant dense<0.000000e+00> : vector<16x64xf32>
    %207 = tpu.matmul %204, %206, %cst_92 {dimension_numbers = #tpu.dot_dimension_numbers<[1], [0], [0], [1], [0, 0, 1, 1], [], []>} : vector<16x32xbf16>, vector<32x64xbf16>, vector<16x64xf32> -> vector<16x64xf32>
    %c0_93 = arith.constant 0 : index
    %c0_94 = arith.constant 0 : index
    %c0_95 = arith.constant 0 : index
    %208 = vector.load %arg17[%c0_93, %c0_94, %c0_95] : memref<1x1x64xf32, #tpu.memory_space<vmem>>, vector<1x1x64xf32>
    %209 = vector.shape_cast %208 : vector<1x1x64xf32> to vector<1x64xf32>
    %210 = vector.broadcast %209 : vector<1x64xf32> to vector<16x64xf32>
    %211 = arith.addf %207, %210 : vector<16x64xf32>
    %cst_96 = arith.constant 0.000000e+00 : f32
    %212 = vector.broadcast %cst_96 : f32 to vector<16x64xf32>
    %213 = arith.maximumf %211, %212 : vector<16x64xf32>
    %214 = arith.truncf %213 : vector<16x64xf32> to vector<16x64xbf16>
    %c0_97 = arith.constant 0 : index
    %c0_98 = arith.constant 0 : index
    %c0_99 = arith.constant 0 : index
    %215 = vector.load %arg18[%c0_97, %c0_98, %c0_99] : memref<1x64x32xbf16, #tpu.memory_space<vmem>>, vector<1x64x32xbf16>
    %216 = vector.shape_cast %215 : vector<1x64x32xbf16> to vector<64x32xbf16>
    %cst_100 = arith.constant dense<0.000000e+00> : vector<16x32xf32>
    %217 = tpu.matmul %214, %216, %cst_100 {dimension_numbers = #tpu.dot_dimension_numbers<[1], [0], [0], [1], [0, 0, 1, 1], [], []>} : vector<16x64xbf16>, vector<64x32xbf16>, vector<16x32xf32> -> vector<16x32xf32>
    %c0_101 = arith.constant 0 : index
    %c0_102 = arith.constant 0 : index
    %c0_103 = arith.constant 0 : index
    %218 = vector.load %arg19[%c0_101, %c0_102, %c0_103] : memref<1x1x32xf32, #tpu.memory_space<vmem>>, vector<1x1x32xf32>
    %219 = vector.shape_cast %218 : vector<1x1x32xf32> to vector<1x32xf32>
    %220 = vector.broadcast %219 : vector<1x32xf32> to vector<16x32xf32>
    %221 = arith.addf %217, %220 : vector<16x32xf32>
    %222 = arith.addf %177, %221 : vector<16x32xf32>
    %223 = vector.shape_cast %222 : vector<16x32xf32> to vector<2x8x32xf32>
    %c0_104 = arith.constant 0 : index
    %c0_105 = arith.constant 0 : index
    %c0_106 = arith.constant 0 : index
    %224 = vector.load %arg20[%c0_104, %c0_105, %c0_106] : memref<2x8x32xf32, #tpu.memory_space<vmem>>, vector<2x8x32xf32>
    tpu.vector_store %arg20[%c0_104, %c0_105, %c0_106], %223 {strides = array<i32>} : memref<2x8x32xf32, #tpu.memory_space<vmem>>, vector<2x8x32xf32>,
    return
  }
  func.func @transform_0(%arg0: i32, %arg1: i32) -> (i32, i32, i32) {
    %c0_i32 = arith.constant 0 : i32
    %c0_i32_0 = arith.constant 0 : i32
    %c0_i32_1 = arith.constant 0 : i32
    return %arg0, %c0_i32, %c0_i32_0 : i32, i32, i32
  }
  func.func @transform_1(%arg0: i32, %arg1: i32) -> (i32, i32, i32) {
    %c0_i32 = arith.constant 0 : i32
    %c0_i32_0 = arith.constant 0 : i32
    %c0_i32_1 = arith.constant 0 : i32
    return %arg0, %c0_i32, %c0_i32_0 : i32, i32, i32
  }
  func.func @transform_2(%arg0: i32, %arg1: i32) -> (i32, i32, i32) {
    %c0_i32 = arith.constant 0 : i32
    %c0_i32_0 = arith.constant 0 : i32
    %c0_i32_1 = arith.constant 0 : i32
    return %arg1, %c0_i32, %c0_i32_0 : i32, i32, i32
  }
  func.func @transform_3(%arg0: i32, %arg1: i32) -> (i32, i32, i32) {
    %c0_i32 = arith.constant 0 : i32
    %c0_i32_0 = arith.constant 0 : i32
    %c0_i32_1 = arith.constant 0 : i32
    return %arg1, %c0_i32, %c0_i32_0 : i32, i32, i32
  }
  func.func @transform_4(%arg0: i32, %arg1: i32) -> (i32, i32, i32) {
    %c0_i32 = arith.constant 0 : i32
    %c0_i32_0 = arith.constant 0 : i32
    %c0_i32_1 = arith.constant 0 : i32
    return %arg1, %c0_i32, %c0_i32_0 : i32, i32, i32
  }
  func.func @transform_5(%arg0: i32, %arg1: i32) -> (i32, i32, i32) {
    %c0_i32 = arith.constant 0 : i32
    %c0_i32_0 = arith.constant 0 : i32
    %c0_i32_1 = arith.constant 0 : i32
    return %arg1, %c0_i32, %c0_i32_0 : i32, i32, i32
  }
  func.func @transform_6(%arg0: i32, %arg1: i32) -> (i32, i32, i32) {
    %c0_i32 = arith.constant 0 : i32
    %c0_i32_0 = arith.constant 0 : i32
    %c0_i32_1 = arith.constant 0 : i32
    return %arg1, %c0_i32, %c0_i32_0 : i32, i32, i32
  }
  func.func @transform_7(%arg0: i32, %arg1: i32) -> (i32, i32, i32) {
    %c0_i32 = arith.constant 0 : i32
    %c0_i32_0 = arith.constant 0 : i32
    %c0_i32_1 = arith.constant 0 : i32
    return %arg1, %c0_i32, %c0_i32_0 : i32, i32, i32
  }
  func.func @transform_8(%arg0: i32, %arg1: i32) -> (i32, i32, i32, i32) {
    %c0_i32 = arith.constant 0 : i32
    %c0_i32_0 = arith.constant 0 : i32
    %c0_i32_1 = arith.constant 0 : i32
    %c0_i32_2 = arith.constant 0 : i32
    return %arg1, %c0_i32, %c0_i32_0, %c0_i32_1 : i32, i32, i32, i32
  }
  func.func @transform_9(%arg0: i32, %arg1: i32) -> (i32, i32, i32) {
    %c0_i32 = arith.constant 0 : i32
    %c0_i32_0 = arith.constant 0 : i32
    %c0_i32_1 = arith.constant 0 : i32
    return %arg1, %c0_i32, %c0_i32_0 : i32, i32, i32
  }
  func.func @transform_10(%arg0: i32, %arg1: i32) -> (i32, i32, i32) {
    %c0_i32 = arith.constant 0 : i32
    %c0_i32_0 = arith.constant 0 : i32
    %c0_i32_1 = arith.constant 0 : i32
    return %arg1, %c0_i32, %c0_i32_0 : i32, i32, i32
  }
  func.func @transform_11(%arg0: i32, %arg1: i32) -> (i32, i32, i32) {
    %c0_i32 = arith.constant 0 : i32
    %c0_i32_0 = arith.constant 0 : i32
    %c0_i32_1 = arith.constant 0 : i32
    return %arg1, %c0_i32, %c0_i32_0 : i32, i32, i32
  }
  func.func @transform_12(%arg0: i32, %arg1: i32) -> (i32, i32, i32) {
    %c0_i32 = arith.constant 0 : i32
    %c0_i32_0 = arith.constant 0 : i32
    %c0_i32_1 = arith.constant 0 : i32
    return %arg1, %c0_i32, %c0_i32_0 : i32, i32, i32
  }
  func.func @transform_13(%arg0: i32, %arg1: i32) -> (i32, i32, i32) {
    %c0_i32 = arith.constant 0 : i32
    %c0_i32_0 = arith.constant 0 : i32
    %c0_i32_1 = arith.constant 0 : i32
    return %arg1, %c0_i32, %c0_i32_0 : i32, i32, i32
  }
  func.func @transform_14(%arg0: i32, %arg1: i32) -> (i32, i32, i32) {
    %c0_i32 = arith.constant 0 : i32
    %c0_i32_0 = arith.constant 0 : i32
    %c0_i32_1 = arith.constant 0 : i32
    return %arg1, %c0_i32, %c0_i32_0 : i32, i32, i32
  }
  func.func @transform_15(%arg0: i32, %arg1: i32) -> (i32, i32, i32) {
    %c0_i32 = arith.constant 0 : i32
    %c0_i32_0 = arith.constant 0 : i32
    %c0_i32_1 = arith.constant 0 : i32
    return %arg1, %c0_i32, %c0_i32_0 : i32, i32, i32
  }
  func.func @transform_16(%arg0: i32, %arg1: i32) -> (i32, i32, i32) {
    %c0_i32 = arith.constant 0 : i32
    %c0_i32_0 = arith.constant 0 : i32
    %c0_i32_1 = arith.constant 0 : i32
    return %arg1, %c0_i32, %c0_i32_0 : i32, i32, i32
  }
  func.func @transform_17(%arg0: i32, %arg1: i32) -> (i32, i32, i32) {
    %c0_i32 = arith.constant 0 : i32
    %c0_i32_0 = arith.constant 0 : i32
    %c0_i32_1 = arith.constant 0 : i32
    return %arg1, %c0_i32, %c0_i32_0 : i32, i32, i32
  }
  func.func @transform_18(%arg0: i32, %arg1: i32) -> (i32, i32, i32) {
    %c0_i32 = arith.constant 0 : i32
    %c0_i32_0 = arith.constant 0 : i32
    %c0_i32_1 = arith.constant 0 : i32
    return %arg0, %c0_i32, %c0_i32_0 : i32, i32, i32
  }
}

</mosaic_0001>

<bundles_post_ra>
// kernel: tpu_custom_call.1
= control target key start
LH: loop header
LB: loop body
LE: loop exit
PB: predicated region body
PF: predicated region fallthrough
CT: control target
= control target key end

     0   :  { %s4094_s0 = inlined_call_operand.hbm [shape: f32[2,8,32], index: 0, kind: input, shape index: {}]   ;;  %s4095_s1 = inlined_call_operand.vmem [shape: f32[2,1,8], index: 1, kind: input, shape index: {}]   ;;  %s4096_s2 = inlined_call_operand.vmem [shape: bf16[2,32,32], index: 2, kind: input, shape index: {}]   ;;  %s4097_s3 = inlined_call_operand.vmem [shape: f32[2,1,32], index: 3, kind: input, shape index: {}]   ;;  %s4098_s4 = inlined_call_operand.vmem [shape: bf16[2,32,32], index: 4, kind: input, shape index: {}]   ;;  %s4099_s5 = inlined_call_operand.vmem [shape: f32[2,1,32], index: 5, kind: input, shape index: {}]   ;;  %s4100_s6 = inlined_call_operand.vmem [shape: bf16[2,32,32], index: 6, kind: input, shape index: {}]   ;;  %s4101_s7 = inlined_call_operand.vmem [shape: f32[2,1,32], index: 7, kind: input, shape index: {}]   ;;  %s4102_s8 = inlined_call_operand.hbm [shape: bf16[2,4,8,32], index: 8, kind: input, shape index: {}]   ;;  %s4103_s9 = inlined_call_operand.vmem [shape: f32[2,1,32], index: 9, kind: input, shape index: {}]   ;;  %s4104_s10 = inlined_call_operand.vmem [shape: f32[2,1,32], index: 10, kind: input, shape index: {}]   ;;  %s4105_s11 = inlined_call_operand.vmem [shape: f32[2,1,32], index: 11, kind: input, shape index: {}]   ;;  %s4106_s12 = inlined_call_operand.vmem [shape: f32[2,1,32], index: 12, kind: input, shape index: {}]   ;;  %s4107_s13 = inlined_call_operand.vmem [shape: f32[2,1,32], index: 13, kind: input, shape index: {}]   ;;  %s4108_s14 = inlined_call_operand.hbm [shape: bf16[2,32,64], index: 14, kind: input, shape index: {}]   ;;  %s4109_s15 = inlined_call_operand.vmem [shape: f32[2,1,64], index: 15, kind: input, shape index: {}]   ;;  %s4110_s16 = inlined_call_operand.vmem [shape: bf16[2,64,32], index: 16, kind: input, shape index: {}]   ;;  %s4111_s17 = inlined_call_operand.vmem [shape: f32[2,1,32], index: 17, kind: input, shape index: {}]   ;;  %s4112_s18 = inlined_call_operand.hbm [shape: f32[2,8,32], index: 18, kind: output, shape index: {}]  }
   0x1   :  { %4131 = sst [smem:[#allocation20_spill]] %s4094_s0 }
   0x2   :  { %4132 = sst [smem:[#allocation21_spill]] %s4095_s1 }
   0x3   :  { %4133 = sst [smem:[#allocation22_spill]] %s4096_s2 }
   0x4   :  { %4134 = sst [smem:[#allocation23_spill]] %s4098_s4 }
   0x5   :  { %4135 = sst [smem:[#allocation24_spill]] %s4100_s6 }
   0x6   :  { %4136 = sst [smem:[#allocation25_spill]] %s4101_s7 }
   0x7   :  { %4137 = sst [smem:[#allocation26_spill]] %s4102_s8 }
   0x8   :  { %4138 = sst [smem:[#allocation27_spill]] %s4103_s9 }
   0x9   :  { %4139 = sst [smem:[#allocation28_spill]] %s4108_s14 }
   0xa   :  { %4140 = sst [smem:[#allocation29_spill]] %s4109_s15 }
   0xb   :  { %4141 = sst [smem:[#allocation30_spill]] %s4110_s16 }
   0xc   :  { %4142 = sst [smem:[#allocation31_spill]] %s4111_s17 }
   0xd   :  { %4143 = sst [smem:[#allocation32_spill]] %s4112_s18 }
   0xe   :  { %23 = vsyncpa [#allocation3], 0 }
   0xf   :  { %24 = vsyncpa [#allocation6], 0 }
  0x10   :  { %26 = vsyncpa [#allocation6 + $0x1], 0 }
  0x11   :  { %27 = vsyncpa [#allocation4], 0  ;;  %s3460_s27 = smov 0   ;;  %s3462_s28 = smov 0  }
  0x12   :  { %s3464_s29 = smov 0   ;;  %s3466_s30 = smov 0  }
  0x13   :  { %s3468_s0 = smov 0   ;;  %s3470_s19 = smov 0  }
  0x14 LB: > { %4144 = sst [smem:[#allocation12_spill]] %s3332_s28  ;;  %s42_s1 = sadd.s32 1, %s3344_s0  ;;  %s3348_s19 = sphi %s3470_s19, %s33_s19   ;;  %s3344_s0 = sphi %s3468_s0, %s4193_s0   ;;  %s3340_s30 = sphi %s3466_s30, %s4192_s30   ;;  %s3336_s29 = sphi %s3464_s29, %s4191_s29   ;;  %s3332_s28 = sphi %s3462_s28, %s4190_s28   ;;  %s3328_s27 = sphi %s3460_s27, %s4189_s27  }
  0x15   : > { %4145 = sst [smem:[#allocation13_spill]] %s3336_s29  ;;  %s260_s20 = sadd.s32 1, %s3336_s29 }
  0x16   : > { %4146 = sst [smem:[#allocation14_spill]] %s3344_s0  ;;  %p43_p0 = scmp.ge.s32.totalorder %s42_s1, 2 }
  0x17   : > { %4147 = sst [smem:[#allocation15_spill]] %s3348_s19  ;;  %p267_p1 = scmp.ne.s32.totalorder %s3336_s29, %s3332_s28 }
  0x18   : > { %p268_p2 = scmp.eq.s32.totalorder %s3348_s19, 0  ;;  %s4195_s1 = smov (%p43_p0, %s42_s1), 0 }
  0x19   : > { %4148 = sst [smem:[#allocation16_spill]] %s4195_s1  ;;  %p3059_p4 = scmp.lt.s32.totalorder %s3348_s19, 2 }
  0x1a   : > { %p269_p3 = por %p268_p2, %p267_p1  ;;  %s257_s21 = ssub.s32 %s3344_s0, %s4195_s1 }
  0x1b   : > { %s623_s22 = sand.u32 1, %s3348_s19   ;;  %p258_p5 = scmp.eq.s32.totalorder %s257_s21, 0 }
  0x1c   : > { %s625_s2 = sand.u32 1, %s3336_s29   ;;  %s4117_s23 = sshll.u32 %s3344_s0, 8 }
  0x1d   : > { %s3504_s24 = scalar_select %p258_p5, %s3336_s29, %s260_s20  }
  0x1e   : > { %s3506_s25 = sshll.u32 %s625_s2, 4  ;;  %s4150_s8 = sld [smem:[#allocation26_spill]] }
  0x1f   : > { %4149 = sst [smem:[#allocation17_spill]] %s3504_s24  ;;  %p3515_p6 = pnand %p3059_p4, %p269_p3 }
  0x20   : > { %s627_s20 = scalar_lea.vmem [#allocation5], %s3506_s25  ;;  %s3522_s2 = scalar_lea.sflag [#allocation6], %s623_s22 }
  0x21   : > { %s634_s21 = sshll.u32 %s627_s20, 4  ;;  %p3178_p8 = pneg %p3515_p6  ;;  %s3520_s21 = int_to_ptr.vmem [resolvable:$true] %s634_s21 }
  0x24   : > { %s3513_s17 = scalar_lea.hbm %s4150_s8, %s4117_s23  ;;  %s3181_s24 = scalar_lea.hbm %s4150_s8, 512 }
  0x25   : > { %s3176_s18 = scalar_lea.hbm %s3513_s17, 256  ;;  %p3182_p11 = scmp.lt.u32.totalorder %s3513_s17, %s4150_s8 }
  0x26   : > { %p3177_p7 = scmp.ne.s32.totalorder %s3513_s17, %s3176_s18  ;;  %p3183_p12 = scmp.lt.u32.totalorder %s3181_s24, %s3176_s18 }
  0x27   : > { %p3185_p0 = scmp.lt.u32.totalorder %s3176_s18, %s3513_s17 }
  0x28   : > { %p3179_p9 = pnand %p3178_p8, %p3177_p7  ;;  %p3184_p13 = por %p3183_p12, %p3182_p11 }
  0x2a   : > { %p3180_p10 = pneg %p3179_p9  ;;  %p3186_p1 = por %p3185_p0, %p3184_p13 }
  0x2c   : > { %p3187_p2 = pnand %p3186_p1, %p3180_p10 }
  0x2e   : > { %3190 = shalt.err (!%p3187_p2)
}
  0x2f   : > { %s3191_s22 = scalar_lea.vmem %s3520_s21, 256  ;;  %s3350_s23 = smov [#allocation5]  }
  0x30   : > { %p3192_p3 = scmp.ne.s32.totalorder %s3520_s21, %s3191_s22  ;;  %s3196_s20 = sshll.u32 %s3350_s23, 4  ;;  %s3197_s20 = int_to_ptr.vmem [resolvable:$false] %s3196_s20 }
  0x31   : > { %s3198_s16 = scalar_lea.vmem %s3197_s20, 512  ;;  %p3199_p7 = scmp.lt.s32.totalorder %s3520_s21, %s3197_s20 }
  0x32   : > { %p3194_p4 = pnand %p3192_p3, %p3178_p8  ;;  %p3200_p9 = scmp.lt.s32.totalorder %s3198_s16, %s3191_s22 }
  0x34   : > { %p3195_p5 = pneg %p3194_p4  ;;  %p3201_p11 = por %p3200_p9, %p3199_p7 }
  0x36   : > { %p3202_p12 = pnand %p3201_p11, %p3195_p5 }
  0x38   : > { %3205 = shalt.err (!%p3202_p12)
}
  0x39   : > { %s4119_s29 = smov 64   ;;  %s4120_s24 = smov 4  }
  0x3a   : > { %3054 = dma.hbm_to_vmem [thread:$0]  (!%p3515_p6), %s3513_s17, 256, %s3520_s21, %s3522_s2, %s4119_s29, %s4119_s29, %s4120_s24  }
  0x3b   : > { %s678_s18 = scalar_lea.vmem [#allocation7], %s3506_s25  ;;  %s3555_s22 = sadd.s32 4294967295, %s3348_s19  }
  0x3c   : > { %s685_s26 = sshll.u32 %s678_s18, 4  ;;  %4152 = sst [smem:[#allocation18_spill]] %s3555_s22  ;;  %s3579_s26 = int_to_ptr.vmem [resolvable:$true] %s685_s26 }
  0x3d   : > { %p273_p10 = scmp.ne.s32.totalorder %s3332_s28, %s3328_s27  ;;  %p4121_p13 = scmp.eq.s32.totalorder %s3555_s22, 0 }
  0x3e   : > { %p2731_p0 = scmp.ge.s32.totalorder %s3348_s19, 1  ;;  %p544_p1 = scmp.lt.s32.totalorder %s3348_s19, 3 }
  0x3f   : > { %p3564_p2 = por %p4121_p13, %p273_p10  ;;  %s4155_s17 = sshll.u32 %s3344_s0, 8 }
  0x40   : > { %p3568_p3 = pnand %p2731_p0, %p544_p1  ;;  %s4156_s14 = sld [smem:[#allocation28_spill]] }
  0x41   : > { %s4153_s23 = scalar_select %p3564_p2, 1, 0 }
  0x42   : > { %s4154_s20 = scalar_select %p3568_p3, 1, 0 }
  0x43   : > { %s3353_s27 = smov [#allocation2]   ;;  %p3047_p4 = pneg %p3568_p3 }
  0x44   : > { %s559_s18 = sshll.u32 %s3353_s27, 4  ;;  %s3583_s18 = int_to_ptr.vmem [resolvable:$true] %s559_s18 }
  0x45   : > { %p3587_p5 = pnand %p3047_p4, %p4121_p13 }
  0x46   : > { %s3577_s16 = scalar_lea.hbm %s4156_s14, %s4155_s17  ;;  %s3211_s27 = scalar_lea.hbm %s4156_s14, 512 }
  0x47   : > { %s3206_s25 = scalar_lea.hbm %s3577_s16, 256  ;;  %p3212_p12 = scmp.lt.u32.totalorder %s3577_s16, %s4156_s14 }
  0x48   : > { %p3207_p7 = scmp.ne.s32.totalorder %s3577_s16, %s3206_s25  ;;  %p3213_p10 = scmp.lt.u32.totalorder %s3211_s27, %s3206_s25 }
  0x49   : > { %p3215_p1 = scmp.lt.u32.totalorder %s3206_s25, %s3577_s16 }
  0x4a   : > { %p3209_p9 = pnand %p3207_p7, %p3178_p8  ;;  %p3214_p0 = por %p3213_p10, %p3212_p12 }
  0x4c   : > { %p3210_p11 = pneg %p3209_p9  ;;  %p3216_p4 = por %p3215_p1, %p3214_p0 }
  0x4e   : > { %p3217_p13 = pnand %p3216_p4, %p3210_p11 }
  0x50   : > { %3220 = shalt.err (!%p3217_p13)
}
  0x51   : > { %s3221_s0 = scalar_lea.vmem %s3579_s26, 256  ;;  %s3354_s17 = smov [#allocation7]  }
  0x52   : > { %p3222_p7 = scmp.ne.s32.totalorder %s3579_s26, %s3221_s0  ;;  %s3226_s21 = sshll.u32 %s3354_s17, 4  ;;  %s3227_s21 = int_to_ptr.vmem [resolvable:$false] %s3226_s21 }
  0x53   : > { %s3228_s8 = scalar_lea.vmem %s3227_s21, 512  ;;  %p3229_p3 = scmp.lt.s32.totalorder %s3579_s26, %s3227_s21 }
  0x54   : > { %p3224_p9 = pnand %p3222_p7, %p3178_p8  ;;  %p3230_p12 = scmp.lt.s32.totalorder %s3228_s8, %s3221_s0 }
  0x56   : > { %p3225_p2 = pneg %p3224_p9  ;;  %p3231_p10 = por %p3230_p12, %p3229_p3 }
  0x58   : > { %p3232_p0 = pnand %p3231_p10, %p3225_p2 }
  0x5a   : > { %3235 = shalt.err (!%p3232_p0)
}
  0x5b   : > { %s4158_s24 = smov 4   ;;  %s4159_s25 = smov 64  }
  0x5c   : > { %3057 = dma.hbm_to_vmem [thread:$0]  (!%p3515_p6), %s3577_s16, 256, %s3579_s26, %s3522_s2, %s4159_s25, %s4159_s25, %s4158_s24  }
  0x5d   : > { %s4160_s17 = sld [smem:[#allocation20_spill]]  ;;  %p3238_p13 = pneg %p3587_p5 }
  0x63   : > { %s3236_s19 = scalar_lea.hbm %s4160_s17, 256 }
  0x64   : > { %p3237_p8 = scmp.ne.s32.totalorder %s4160_s17, %s3236_s19  ;;  %p3243_p11 = scmp.lt.u32.totalorder %s3236_s19, %s4160_s17 }
  0x66   : > { %p3239_p2 = pnand %p3238_p13, %p3237_p8 }
  0x68   : > { %p3240_p3 = pneg %p3239_p2 }
  0x6a   : > { %p3245_p1 = pnand %p3243_p11, %p3240_p3 }
  0x6c   : > { %3248 = shalt.err (!%p3245_p1)
}
  0x6d   : > { %s3249_s2 = scalar_lea.vmem %s3583_s18, 256  ;;  %p3257_p9 = scmp.lt.s32.totalorder %s3583_s18, %s3583_s18 }
  0x6e   : > { %p3250_p6 = scmp.ne.s32.totalorder %s3583_s18, %s3249_s2  ;;  %p3258_p12 = scmp.lt.s32.totalorder %s3249_s2, %s3249_s2 }
  0x70   : > { %p3252_p4 = pnand %p3250_p6, %p3238_p13  ;;  %p3259_p10 = por %p3258_p12, %p3257_p9 }
  0x72   : > { %p3253_p7 = pneg %p3252_p4 }
  0x74   : > { %p3260_p0 = pnand %p3259_p10, %p3253_p7 }
  0x76   : > { %3263 = shalt.err (!%p3260_p0)
}
  0x77   : > { %s3355_s14 = smov 128   ;;  %s3356_s15 = smov 8  }
  0x78   : > { %3050 = dma.hbm_to_vmem [thread:$0]  (!%p3587_p5), %s4160_s17, 256, %s3583_s18, [#allocation3], %s3355_s14, %s3355_s14, %s3356_s15  }
  0x79   : > { %p4161_p8 = scmp.ne.s32.totalorder %s4154_s20, 0 }
  0x7b   : > { %717 = sbr.rel (%p4161_p8) target bundleno = 4492 (0x118c), region = 92 }
  0x82   : > { %p4162_p13 = scmp.eq.s32.totalorder %s3555_s22, 0 }
  0x84   : > { %3315 = dma.done.wait (%p4162_p13), [#allocation3], 256   ;;  %p4163_p2 = pmov %p4162_p13 }
  0x85   : > { %s723_s16 = sand.u32 1, %s3555_s22   ;;  %s725_s8 = sand.u32 1, %s3332_s28  }
  0x86   : > { %3317 = vsyncadd (%p4163_p2), [#allocation3], 4294967040  ;;  %s3647_s24 = sshll.u32 %s725_s8, 4  ;;  %s724_s29 = scalar_lea.sflag [#allocation6], %s723_s16 }
  0x87   : > { %s3650_s25 = scalar_lea.vmem [#allocation5], %s3647_s24  ;;  %p4165_p5 = scmp.ne.s32.totalorder %s4153_s23, 0 }
  0x88   : > { %4164 = sst [smem:[#allocation19_spill]] %s3650_s25 }
  0x89   : > { %3319 = dma.done.wait (%p4165_p5), %s724_s29, 512  }
  0x8a   : > { %3321 = vsyncadd (%p4165_p5), %s724_s29, 4294966784  ;;  %p849_p3 = scmp.lt.s32.totalorder %s3340_s30, 1  ;;  %s4166_s2 = sld [smem:[#allocation22_spill]] }
  0x8b   : > { %s4167_s4 = sld [smem:[#allocation23_spill]]  ;;  %s4168_s6 = sld [smem:[#allocation24_spill]] }
  0x8c   : > { %s3658_s20 = scalar_select %p849_p3, %s3340_s30, 1 }
  0x8d   : > { %s4171_s1 = sld [smem:[#allocation29_spill]]  ;;  %s4172_s19 = sld [smem:[#allocation30_spill]] }
  0x8e   : > { %s2810_s18 = sshll.u32 %s3658_s20, 4  ;;  %s884_s17 = scalar_lea.vmem %s4106_s12, %s3658_s20 }
  0x8f   : > { %s887_s21 = scalar_lea.vmem %s4107_s13, %s3658_s20  ;;  %s2813_s22 = sshll.u32 %s3658_s20, 5 }
  0x90   : > { %s3668_s14 = scalar_lea.vmem %s4166_s2, %s2810_s18  ;;  %s4173_s8 = sld [smem:[#allocation31_spill]] }
  0x91   : > { %s3673_s26 = scalar_lea.vmem %s4167_s4, %s2810_s18  ;;  %s3682_s23 = scalar_lea.vmem %s4168_s6, %s2810_s18 }
  0x92   : > { %s736_s29 = scalar_lea.vmem [#allocation7], %s3647_s24  ;;  %p2753_p11 = scmp.ne.s32.totalorder %s3340_s30, 0 }
  0x93   : > { %s890_s2 = scalar_lea.vmem %s4171_s1, %s3658_s20  ;;  %s3716_s4 = scalar_lea.vmem %s4172_s19, %s2813_s22  ;;  %v905_v0 = vld [vmem:[#allocation2] sm:$0xff] (!%p2753_p11)  ;;  %vm907_vm0 = vcmask (!%p2753_p11), 261120   ;;  %v906_v1 = vld [vmem:[#allocation2 + $0x8] sm:$0xff] (!%p2753_p11) }
  0x94   : > { %904 = sbr.rel (%p2753_p11) target bundleno = 155 (0x9b), region = 108  ;;  %908 = vst.msk [vmem:[#allocation8] sm:$0xff] (!%p2753_p11), %vm907_vm0, %v905_v0  ;;  %909 = vst.msk [vmem:[#allocation8 + $0x8] sm:$0xff] (!%p2753_p11), %vm907_vm0, %v906_v1 }
  0x96   : > { %s898_s7 = scalar_lea.vmem %s4173_s8, %s3658_s20 }
  0x9b PF: > { %v3724_v2 = vld [vmem:[#allocation8] sm:$0xff]  ;;  %vm920_vm1 = vcmask 261120   ;;  %v3726_v3 = vld [vmem:[#allocation8 + $0x8] sm:$0xff]  ;;  %v3124_v16 = vld [vmem:[%s3668_s14] sm:$0xff]   ;;  %v3357_v18 = vmov 0.0   ;;  %vm3358_vm2 = vmmov 0   ;;  %s4174_s30 = scalar_lea.vmem %s4104_s10, %s3658_s20  ;;  %s4176_s8 = scalar_lea.vmem %s4099_s5, %s3658_s20 }
  0x9c   : > { %v921_v4 = vsel %vm920_vm1, %v3724_v2, 0.0  ;;  %v924_v5 = vsel %vm920_vm1, %v3726_v3, 0.0  ;;  %v3125_v17 = vld [vmem:[%s3682_s23] sm:$0xff]   ;;  %2871 = vmatprep.subr.bf16.mxu1 %v3357_v18  ;;  %2887 = vmatprep.subr.bf16.mxu0 %v3357_v18  ;;  %v3126_v19 = vld [vmem:[%s3668_s14 + $0x8] sm:$0xff]   ;;  %s4177_s27 = scalar_lea.vmem %s4097_s3, %s3658_s20  ;;  %s4178_s19 = sld [smem:[#allocation25_spill]]  ;;  %vm1180_vm3 = vcmask 64512  }
  0x9d   : > { %922 = vadd.xlane.f32.xlu0 %v921_v4  ;;  %2872 = vmatpush3.bf16.msra.mxu1 %v3124_v16  ;;  %v3127_v20 = vld [vmem:[%s3682_s23 + $0x8] sm:$0xff]   ;;  %v2754_v29 = vld [vmem:[%s4174_s30] ss:$0 sm:$0xff]  ;;  %s4175_s23 = scalar_lea.vmem %s4105_s11, %s3658_s20  ;;  %vm1300_vm4 = vcmask 1043456   ;;  %s4180_s9 = sld [smem:[#allocation21_spill]]  ;;  %vm2424_vm7 = vcmask 523264  }
  0x9e   : > { %2888 = vmatpush3.bf16.msra.mxu0 %v3125_v17  ;;  %2873 = vmatprep.subr.bf16.mxu1 %v3357_v18  ;;  %v2755_v33 = vld [vmem:[%s4175_s23] ss:$0 sm:$0xff]  ;;  %v3129_v39 = vld [vmem:[%s3673_s26 + $0x8] sm:$0xff]   ;;  %s3359_s14 = smov 120   ;;  %s3360_s23 = smov 112  }
  0x9f   : > { %2889 = vmatprep.subr.bf16.mxu0 %v3357_v18  ;;  %2875 = vmatprep.mubr.msk.bf16.mxu1 %vm3358_vm2, %v3357_v18  ;;  %v3128_v37 = vld [vmem:[%s3673_s26] sm:$0xff]   ;;  %s4181_s26 = sld [smem:[#allocation19_spill]]  ;;  %s3361_s0 = smov 104  }
  0xa0   : > { %2891 = vmatprep.mubr.msk.bf16.mxu0 %vm3358_vm2, %v3357_v18  ;;  %v2760_v48 = vld [vmem:[%s4176_s8] ss:$0 sm:$0xff]  ;;  %s4182_s18 = sld [smem:[#allocation27_spill]] }
  0xa1   : > { %925 = vadd.xlane.f32.xlu0 %v924_v5  ;;  %2874 = vmatpush3.bf16.msra.mxu1 %v3126_v19  ;;  %v2756_v49 = vld [vmem:[%s4177_s27] ss:$0 sm:$0xff] }
  0xa2   : > { %2890 = vmatpush3.bf16.msra.mxu0 %v3127_v20  ;;  %2879 = vmatprep.subr.bf16.mxu1 %v3357_v18  ;;  %s4179_s25 = scalar_lea.vmem %s4178_s19, %s3658_s20 }
  0xa3   : > { %2901 = vmatprep.subr.bf16.mxu0 %v3357_v18  ;;  %v2764_v53 = vld [vmem:[%s4179_s25] ss:$0 sm:$0xff] }
  0xa6   : > { %s4183_s27 = scalar_lea.vmem %s4182_s18, %s3658_s20 }
 0x12a   : > { %v923_v6 = vpop.xlane.xlu0 %922 }
 0x12b   : > { %v928_v7 = vmul.f32 0.03125, %v923_v6 }
 0x12d   : > { %v930_v8 = vsub.f32 %v3724_v2, %v928_v7 }
 0x12e   : > { %v926_v9 = vpop.xlane.xlu0 %925 }
 0x12f   : > { %v929_v10 = vmul.f32 0.03125, %v926_v9  ;;  %v932_v11 = vmul.f32 %v930_v8, %v930_v8 }
 0x131   : > { %v931_v12 = vsub.f32 %v3726_v3, %v929_v10  ;;  %v934_v13 = vsel %vm920_vm1, %v932_v11, 0.0  ;;  %v1170_v11 = vlaneseq }
 0x132   : > { %935 = vadd.xlane.f32.xlu1 %v934_v13 }
 0x133   : > { %v933_v14 = vmul.f32 %v931_v12, %v931_v12  ;;  %v1171_v13 = vshrl.u32 %v1170_v11, 7 }
 0x135   : > { %v937_v15 = vsel %vm920_vm1, %v933_v14, 0.0  ;;  %v913_v14 = vld [vmem:[%s4180_s9 + $0x1] sm:$0x1] }
 0x136   : > { %938 = vadd.xlane.f32.xlu1 %v937_v15  ;;  %v1172_v15 = vsub.s32 0, %v1171_v13  ;;  %vm915_vm6 = vcmp.eq.f32.partialorder %v913_v14, 0.0 }
 0x137   : > { %v917_v17 = vsel %vm915_vm6, -1e+30, %v3357_v18 }
 0x138   : > { %v3830_v20 = vrot.slane %v917_v17, %v1172_v15 }
 0x1bf   : > { %v936_v21 = vpop.xlane.xlu1 %935 }
 0x1c0   : > { %v940_v22 = vmul.f32 0.03125, %v936_v21 }
 0x1c2   : > { %v942_v23 = vadd.f32 1e-05, %v940_v22 }
 0x1c3   : > { %v939_v24 = vpop.xlane.xlu1 %938 }
 0x1c4   : > { %3136 = vrsqrt.f32 %v942_v23  ;;  %v941_v25 = vmul.f32 0.03125, %v939_v24 }
 0x1c6   : > { %v943_v26 = vadd.f32 1e-05, %v941_v25 }
 0x1c8   : > { %3138 = vrsqrt.f32 %v943_v26 }
 0x1ce   : > { %v3137_v27 = vpop.eup %3136 }
 0x1cf   : > { %v946_v28 = vmul.f32 %v3137_v27, %v930_v8 }
 0x1d1   : > { %v954_v32 = vmul.f32 %v2754_v29, %v946_v28 }
 0x1d2   : > { %v3139_v30 = vpop.eup %3138 }
 0x1d3   : > { %v947_v31 = vmul.f32 %v3139_v30, %v931_v12  ;;  %v962_v35 = vadd.f32 %v2755_v33, %v954_v32  ;;  %v912_v12 = vld [vmem:[%s4180_s9] sm:$0x1] }
 0x1d4   : > { %vm914_vm5 = vcmp.eq.f32.partialorder %v912_v12, 0.0 }
 0x1d5   : > { %v955_v34 = vmul.f32 %v2754_v29, %v947_v31  ;;  %v916_v16 = vsel %vm914_vm5, -1e+30, %v3357_v18 }
 0x1d6   : > { %v3828_v19 = vrot.slane %v916_v16, %v1172_v15 }
 0x1d7   : > { %v963_v36 = vadd.f32 %v2755_v33, %v955_v34 }
 0x1d9   : > { %v964_v38 = vpack.c.bf16 %v963_v36, %v962_v35 }
 0x1db   : > { %2876 = vmatmul.mubr.msk.bf16.vlgmr.msra.gmra.mrb[0].mxu1 %vm920_vm1, %v964_v38  ;;  %2892 = vmatmul.mubr.msk.bf16.vlgmr.msra.gmra.mrb[0].mxu0 %vm920_vm1, %v964_v38 }
 0x1dc   : > { %2880 = vmatpush3.bf16.msra.mxu1 %v3128_v37  ;;  %2883 = vmatprep.mubr.msk.bf16.mxu1 %vm3358_vm2, %v3357_v18 }
 0x1dd   : > { %2881 = vmatprep.subr.bf16.mxu1 %v3357_v18  ;;  %2903 = vmatprep.mubr.msk.bf16.mxu0 %vm3358_vm2, %v3357_v18 }
 0x1e0   : > { %2882 = vmatpush3.bf16.msra.mxu1 %v3129_v39 }
 0x1e1   : > { %2895 = vmatprep.subr.bf16.mxu1 %v3357_v18 }
 0x1e3   : > { %2884 = vmatmul.mubr.msk.bf16.vlgmr.msra.gmra.mrb[4].mxu1 %vm920_vm1, %v964_v38 }
 0x1e4   : > { %2897 = vmatprep.mubr.msk.bf16.mxu1 %vm3358_vm2, %v3357_v18 }
 0x2ae   : > { %v1025_v40 = vpop.f32.mrb[0].mxu1  ;;  %v1153_v41 = vpop.f32.mrb[0].mxu0 }
 0x2af   : > { %v2877_v42 = vpop.f32.mrb[1].mxu1  ;;  %v2893_v43 = vpop.f32.mrb[1].mxu0  ;;  %v1026_v55 = vadd.f32 %v2756_v49, %v1025_v40  ;;  %v1154_v59 = vadd.f32 %v2764_v53, %v1153_v41 }
 0x2b0   : > { %v1028_v44 = vpop.f32.mrb[2].mxu1  ;;  %v1156_v45 = vpop.f32.mrb[2].mxu0 }
 0x2b1   : > { %v2878_v46 = vpop.f32.mrb[3].mxu1  ;;  %v2894_v47 = vpop.f32.mrb[3].mxu0  ;;  %v1029_v60 = vadd.f32 %v2756_v49, %v1028_v44  ;;  %v1160_v63 = vmul.f32 0.35355338, %v1026_v55  ;;  %v1157_v0 = vadd.f32 %v2764_v53, %v1156_v45  ;;  %v3797_v4 = vpack.c.bf16 %v1154_v59, %v1154_v59 }
 0x2b3   : > { %v1161_v5 = vmul.f32 0.35355338, %v1029_v60  ;;  %v3800_v6 = vpack.c.bf16 %v1160_v63, %v1160_v63  ;;  %v3802_v7 = vpack.c.bf16 %v1157_v0, %v1157_v0  ;;  %v1302_v9 = vsel %vm1300_vm4, %v3797_v4, 0 }
 0x2b5   : > { %v3804_v8 = vpack.c.bf16 %v1161_v5, %v1161_v5  ;;  %v1348_v10 = vsel %vm1300_vm4, %v3802_v7, 0 }
 0x2b6   : > { %v1089_v50 = vpop.f32.mrb[4].mxu1 }
 0x2b7   : > { %v1090_v51 = vadd.f32 %v2760_v48, %v1089_v50  ;;  %v2885_v52 = vpop.f32.mrb[5].mxu1 }
 0x2b8   : > { %v1092_v54 = vpop.f32.mrb[6].mxu1 }
 0x2b9   : > { %v3788_v56 = vpack.c.bf16 %v1090_v51, %v1090_v51  ;;  %v1093_v57 = vadd.f32 %v2760_v48, %v1092_v54  ;;  %v2886_v58 = vpop.f32.mrb[7].mxu1 }
 0x2bb   : > { %v3790_v61 = vpack.c.bf16 %v1093_v57, %v1093_v57  ;;  %v1185_v62 = vsel %vm1180_vm3, %v3788_v56, 0 }
 0x2bc   : > { %2896 = vmatpush3.bf16.xpose.msra.mxu1 %v1185_v62 }
 0x2bd   : > { %v1231_v1 = vsel %vm1180_vm3, %v3790_v61, 0  ;;  %2907 = vmatprep.subr.bf16.mxu1 %v3357_v18 }
 0x2be   : > { %2902 = vmatpush3.bf16.xpose.msra.mxu0 %v1231_v1 }
 0x2bf   : > { %2913 = vmatprep.subr.bf16.mxu0 %v3357_v18 }
 0x2c3   : > { %2898 = vmatmul.mubr.msk.bf16.vlgmr.msra.gmra.mrb[8].mxu1 %vm1180_vm3, %v3800_v6 }
 0x2c4   : > { %2908 = vmatpush3.bf16.msra.mxu1 %v1302_v9  ;;  %2909 = vmatprep.mubr.msk.bf16.mxu1 %vm3358_vm2, %v3357_v18 }
 0x2c5   : > { %2904 = vmatmul.mubr.msk.bf16.vlgmr.msra.gmra.mrb[4].mxu0 %vm1180_vm3, %v3804_v8  ;;  %2919 = vmatprep.subr.bf16.mxu1 %v3357_v18 }
 0x2c6   : > { %2914 = vmatpush3.bf16.msra.mxu0 %v1348_v10  ;;  %2915 = vmatprep.mubr.msk.bf16.mxu0 %vm3358_vm2, %v3357_v18 }
 0x2c7   : > { %2925 = vmatprep.subr.bf16.mxu0 %v3357_v18 }
 0x396   : > { %v1221_v21 = vpop.f32.mrb[8].mxu1 }
 0x397   : > { %v1222_v22 = vadd.f32 %v1221_v21, %v3828_v19  ;;  %v2899_v23 = vpop.f32.mrb[9].mxu1 }
 0x398   : > { %v1224_v24 = vpop.f32.mrb[10].mxu1  ;;  %v1267_v25 = vpop.f32.mrb[4].mxu0 }
 0x399   : > { %v1268_v26 = vadd.f32 %v1267_v25, %v3830_v20  ;;  %v2900_v27 = vpop.f32.mrb[11].mxu1  ;;  %v2905_v28 = vpop.f32.mrb[5].mxu0  ;;  %v1273_v29 = vsel %vm1180_vm3, %v1222_v22, -inf }
 0x39a   : > { %v1270_v30 = vpop.f32.mrb[6].mxu0  ;;  %1274 = vmax.xlane.f32.xlu0 %v1273_v29 }
 0x39b   : > { %v2906_v31 = vpop.f32.mrb[7].mxu0  ;;  %v1276_v32 = vsel %vm1180_vm3, %v1268_v26, -inf }
 0x39c   : > { %1277 = vmax.xlane.f32.xlu1 %v1276_v32 }
 0x3ad   : > { %1448 = vrot.lane.b32.xlu1 %v3790_v61, %s3359_s14 }
 0x427   : > { %v1275_v33 = vpop.xlane.xlu0 %1274 }
 0x428   : > { %v1279_v34 = vsub.f32 %v1222_v22, %v1275_v33 }
 0x429   : > { %v1278_v35 = vpop.xlane.xlu1 %1277 }
 0x42a   : > { %v1281_v36 = vmul.f32 1.442695, %v1279_v34  ;;  %v1280_v37 = vsub.f32 %v1268_v26, %v1278_v35 }
 0x42c   : > { %3140 = vpow2.f32 %v1281_v36  ;;  %v1283_v38 = vmul.f32 1.442695, %v1280_v37 }
 0x42d   : > { %v1449_v43 = vpop.permute.xlu1 %1448 }
 0x42e   : > { %3142 = vpow2.f32 %v1283_v38  ;;  %v1454_v54 = vsel %vm1180_vm3, %v1449_v43, 0 }
 0x436   : > { %v3141_v39 = vpop.eup %3140 }
 0x437   : > { %v1285_v40 = vsel %vm1180_vm3, %v3141_v39, 0.0 }
 0x438   : > { %v3143_v41 = vpop.eup %3142  ;;  %1286 = vadd.xlane.f32.xlu0 %v1285_v40 }
 0x439   : > { %v1288_v42 = vsel %vm1180_vm3, %v3143_v41, 0.0 }
 0x43a   : > { %1289 = vadd.xlane.f32.xlu1 %v1288_v42  ;;  %v2776_v42 = vld [vmem:[%s4181_s26 + $0x4] sm:$0xf] }
 0x44b   : > { %1393 = vrot.lane.b32.xlu1 %v3800_v6, %s3359_s14 }
 0x44e   : > { %1396 = vrot.lane.b32.xlu0 %v3788_v56, %s3359_s14 }
 0x44f   : > { %1445 = vrot.lane.b32.xlu1 %v3804_v8, %s3359_s14 }
 0x4c5   : > { %v1287_v44 = vpop.xlane.xlu0 %1286 }
 0x4c6   : > { %3144 = vrcp.f32 %v1287_v44 }
 0x4c7   : > { %v1290_v45 = vpop.xlane.xlu1 %1289 }
 0x4c8   : > { %3146 = vrcp.f32 %v1290_v45  ;;  %v1625_v45 = vsel %vm1300_vm4, %v2776_v42, 0 }
 0x4c9   : > { %v1397_v49 = vpop.permute.xlu0 %1396 }
 0x4ca   : > { %v1402_v52 = vsel %vm1180_vm3, %v1397_v49, 0 }
 0x4cb   : > { %v1394_v55 = vpop.permute.xlu1 %1393 }
 0x4cf   : > { %v1446_v57 = vpop.permute.xlu1 %1445 }
 0x4d0   : > { %v3145_v46 = vpop.eup %3144 }
 0x4d1   : > { %v1293_v47 = vmul.f32 %v3145_v46, %v3141_v39 }
 0x4d2   : > { %v3147_v48 = vpop.eup %3146 }
 0x4d3   : > { %v1294_v50 = vmul.f32 %v3147_v48, %v3143_v41  ;;  %v1295_v51 = vpack.c.bf16 %v1293_v47, %v1293_v47  ;;  %v1391_v47 = vld [vmem:[%s4181_s26] sm:$0xf] }
 0x4d5   : > { %2910 = vmatmul.mubr.msk.bf16.vlgmr.msra.gmra.mrb[12].mxu1 %vm1180_vm3, %v1295_v51  ;;  %v1296_v53 = vpack.c.bf16 %v1294_v50, %v1294_v50  ;;  %v1672_v50 = vsel %vm1300_vm4, %v1391_v47, 0 }
 0x4d6   : > { %2920 = vmatpush3.bf16.xpose.msra.mxu1 %v1402_v52  ;;  %2921 = vmatprep.mubr.msk.bf16.mxu1 %vm3358_vm2, %v3357_v18 }
 0x4d7   : > { %2916 = vmatmul.mubr.msk.bf16.vlgmr.msra.gmra.mrb[8].mxu0 %vm1180_vm3, %v1296_v53  ;;  %2931 = vmatprep.subr.bf16.mxu1 %v3357_v18 }
 0x4d8   : > { %2926 = vmatpush3.bf16.xpose.msra.mxu0 %v1454_v54  ;;  %2927 = vmatprep.mubr.msk.bf16.mxu0 %vm3358_vm2, %v3357_v18 }
 0x4d9   : > { %2937 = vmatprep.subr.bf16.mxu0 %v3357_v18 }
 0x4dd   : > { %2922 = vmatmul.mubr.msk.bf16.vlgmr.msra.gmra.mrb[16].mxu1 %vm1180_vm3, %v1394_v55 }
 0x4de   : > { %2933 = vmatprep.mubr.msk.bf16.mxu1 %vm3358_vm2, %v3357_v18 }
 0x4df   : > { %2928 = vmatmul.mubr.msk.bf16.vlgmr.msra.gmra.mrb[12].mxu0 %vm1180_vm3, %v1446_v57 }
 0x4e0   : > { %2939 = vmatprep.mubr.msk.bf16.mxu0 %vm3358_vm2, %v3357_v18 }
 0x5a8   : > { %v3862_v58 = vpop.f32.mrb[12].mxu1 }
 0x5a9   : > { %v2911_v59 = vpop.f32.mrb[13].mxu1 }
 0x5aa   : > { %v1341_v60 = vpop.f32.mrb[14].mxu1  ;;  %v3864_v62 = vpop.f32.mrb[8].mxu0 }
 0x5ab   : > { %v1390_v63 = vpack.c.bf16 %v3864_v62, %v3862_v58  ;;  %v2912_v0 = vpop.f32.mrb[15].mxu1  ;;  %v2917_v1 = vpop.f32.mrb[9].mxu0 }
 0x5ac   : > { %v1387_v5 = vpop.f32.mrb[10].mxu0 }
 0x5ad   : > { %v2918_v9 = vpop.f32.mrb[11].mxu0 }
 0x5b0   : > { %v1438_v10 = vpop.f32.mrb[16].mxu1 }
 0x5b1   : > { %v1439_v11 = vadd.f32 %v1438_v10, %v3828_v19  ;;  %v2923_v12 = vpop.f32.mrb[17].mxu1 }
 0x5b2   : > { %v1441_v13 = vpop.f32.mrb[18].mxu1  ;;  %v1490_v14 = vpop.f32.mrb[12].mxu0 }
 0x5b3   : > { %v1491_v15 = vadd.f32 %v1490_v14, %v3830_v20  ;;  %v2924_v16 = vpop.f32.mrb[19].mxu1  ;;  %v2929_v17 = vpop.f32.mrb[13].mxu0  ;;  %v1496_v21 = vsel %vm1180_vm3, %v1439_v11, -inf }
 0x5b4   : > { %v1493_v22 = vpop.f32.mrb[14].mxu0  ;;  %1497 = vmax.xlane.f32.xlu0 %v1496_v21 }
 0x5b5   : > { %v2930_v23 = vpop.f32.mrb[15].mxu0  ;;  %v1499_v24 = vsel %vm1180_vm3, %v1491_v15, -inf }
 0x5b6   : > { %1500 = vmax.xlane.f32.xlu1 %v1499_v24 }
 0x5c7   : > { %1570 = vrot.lane.b32.xlu1 %v3802_v7, %s3359_s14 }
 0x5cb   : > { %1717 = vrot.lane.b32.xlu1 %v3788_v56, %s3360_s23 }
 0x5cf   : > { %1767 = vrot.lane.b32.xlu1 %v3790_v61, %s3360_s23 }
 0x5d3   : > { %1765 = vrot.lane.b32.xlu1 %v3804_v8, %s3360_s23 }
 0x641   : > { %v1498_v25 = vpop.xlane.xlu0 %1497 }
 0x642   : > { %v1502_v26 = vsub.f32 %v1439_v11, %v1498_v25 }
 0x643   : > { %v1501_v27 = vpop.xlane.xlu1 %1500 }
 0x644   : > { %v1504_v28 = vmul.f32 1.442695, %v1502_v26  ;;  %v1503_v29 = vsub.f32 %v1491_v15, %v1501_v27 }
 0x646   : > { %3148 = vpow2.f32 %v1504_v28  ;;  %v1506_v30 = vmul.f32 1.442695, %v1503_v29 }
 0x647   : > { %v1571_v31 = vpop.permute.xlu1 %1570 }
 0x648   : > { %3150 = vpow2.f32 %v1506_v30  ;;  %v1576_v32 = vsel %vm1300_vm4, %v1571_v31, 0 }
 0x649   : > { %2938 = vmatpush3.bf16.msra.mxu0 %v1576_v32 }
 0x64a   : > { %2949 = vmatprep.subr.bf16.mxu0 %v3357_v18 }
 0x64b   : > { %v1718_v51 = vpop.permute.xlu1 %1717 }
 0x64c   : > { %v1723_v1 = vsel %vm1180_vm3, %v1718_v51, 0 }
 0x64f   : > { %v1768_v52 = vpop.permute.xlu1 %1767 }
 0x650   : > { %v3149_v33 = vpop.eup %3148  ;;  %v1773_v53 = vsel %vm1180_vm3, %v1768_v52, 0 }
 0x651   : > { %v1508_v34 = vsel %vm1180_vm3, %v3149_v33, 0.0 }
 0x652   : > { %v3151_v35 = vpop.eup %3150  ;;  %1509 = vadd.xlane.f32.xlu0 %v1508_v34 }
 0x653   : > { %v1511_v36 = vsel %vm1180_vm3, %v3151_v35, 0.0  ;;  %v1766_v54 = vpop.permute.xlu1 %1765 }
 0x656   : > { %1512 = vadd.xlane.f32.xlu0 %v1511_v36 }
 0x66c   : > { %1521 = vrot.lane.b32.xlu0 %v3797_v4, %s3359_s14 }
 0x670   : > { %1715 = vrot.lane.b32.xlu0 %v3800_v6, %s3360_s23 }
 0x6df   : > { %v1510_v37 = vpop.xlane.xlu0 %1509 }
 0x6e0   : > { %3152 = vrcp.f32 %v1510_v37 }
 0x6e3   : > { %v1513_v38 = vpop.xlane.xlu0 %1512 }
 0x6e4   : > { %3154 = vrcp.f32 %v1513_v38 }
 0x6e7   : > { %v1522_v39 = vpop.permute.xlu0 %1521 }
 0x6e8   : > { %v1527_v40 = vsel %vm1300_vm4, %v1522_v39, 0 }
 0x6e9   : > { %2932 = vmatpush3.bf16.msra.mxu1 %v1527_v40 }
 0x6ea   : > { %v3153_v41 = vpop.eup %3152  ;;  %2943 = vmatprep.subr.bf16.mxu1 %v3357_v18 }
 0x6eb   : > { %v1516_v43 = vmul.f32 %v3153_v41, %v3149_v33  ;;  %v1716_v11 = vpop.permute.xlu0 %1715 }
 0x6ed   : > { %v1518_v44 = vpack.c.bf16 %v1516_v43, %v1516_v43 }
 0x6ee   : > { %v3155_v46 = vpop.eup %3154 }
 0x6ef   : > { %v1517_v48 = vmul.f32 %v3155_v46, %v3151_v35  ;;  %2934 = vmatmul.mubr.msk.bf16.vlgmr.msra.gmra.mrb[20].mxu1 %vm1180_vm3, %v1518_v44 }
 0x6f0   : > { %2944 = vmatpush3.bf16.msra.mxu1 %v1625_v45  ;;  %2945 = vmatprep.mubr.msk.bf16.mxu1 %vm3358_vm2, %v3357_v18 }
 0x6f1   : > { %v1519_v49 = vpack.c.bf16 %v1517_v48, %v1517_v48  ;;  %2955 = vmatprep.subr.bf16.mxu1 %v3357_v18 }
 0x6f3   : > { %2940 = vmatmul.mubr.msk.bf16.vlgmr.msra.gmra.mrb[16].mxu0 %vm1180_vm3, %v1519_v49 }
 0x6f4   : > { %2950 = vmatpush3.bf16.msra.mxu0 %v1672_v50  ;;  %2951 = vmatprep.mubr.msk.bf16.mxu0 %vm3358_vm2, %v3357_v18 }
 0x6f5   : > { %2961 = vmatprep.subr.bf16.mxu0 %v3357_v18 }
 0x6fb   : > { %2952 = vmatmul.mubr.msk.bf16.vlgmr.msra.gmra.mrb[20].mxu0 %vm1180_vm3, %v1390_v63 }
 0x6fc   : > { %2963 = vmatprep.mubr.msk.bf16.mxu0 %vm3358_vm2, %v3357_v18 }
 0x6fd   : > { %2962 = vmatpush3.bf16.xpose.msra.mxu0 %v1773_v53 }
 0x6fe   : > { %2973 = vmatprep.subr.bf16.mxu0 %v3357_v18 }
 0x704   : > { %2964 = vmatmul.mubr.msk.bf16.vlgmr.msra.gmra.mrb[24].mxu0 %vm1180_vm3, %v1766_v54 }
 0x705   : > { %2975 = vmatprep.mubr.msk.bf16.mxu0 %vm3358_vm2, %v3357_v18 }
 0x7c2   : > { %v1563_v55 = vpop.f32.mrb[20].mxu1 }
 0x7c3   : > { %v2935_v57 = vpop.f32.mrb[21].mxu1 }
 0x7c4   : > { %v1566_v59 = vpop.f32.mrb[22].mxu1 }
 0x7c5   : > { %v2936_v58 = vpop.f32.mrb[23].mxu1 }
 0x7c6   : > { %v1612_v60 = vpop.f32.mrb[16].mxu0 }
 0x7c7   : > { %v1618_v62 = vpack.c.bf16 %v1612_v60, %v1563_v55  ;;  %v2941_v63 = vpop.f32.mrb[17].mxu0 }
 0x7c8   : > { %v1615_v0 = vpop.f32.mrb[18].mxu0 }
 0x7c9   : > { %v2942_v5 = vpop.f32.mrb[19].mxu0  ;;  %2946 = vmatmul.mubr.msk.bf16.vlgmr.msra.gmra.mrb[24].mxu1 %vm1180_vm3, %v1618_v62  ;;  %v2783_v62 = vld [vmem:[%s4181_s26 + $0x8] sm:$0xf] }
 0x7ca   : > { %2956 = vmatpush3.bf16.xpose.msra.mxu1 %v1723_v1  ;;  %2957 = vmatprep.mubr.msk.bf16.mxu1 %vm3358_vm2, %v3357_v18  ;;  %v1942_v63 = vsel %vm1300_vm4, %v2783_v62, 0 }
 0x7cb   : > { %2967 = vmatprep.subr.bf16.mxu1 %v3357_v18 }
 0x7ce   : > { %v1708_v9 = vpop.f32.mrb[20].mxu0 }
 0x7cf   : > { %v2953_v10 = vpop.f32.mrb[21].mxu0 }
 0x7d0   : > { %v1711_v12 = vpop.f32.mrb[22].mxu0 }
 0x7d1   : > { %v2954_v13 = vpop.f32.mrb[23].mxu0  ;;  %2958 = vmatmul.mubr.msk.bf16.vlgmr.msra.gmra.mrb[28].mxu1 %vm1180_vm3, %v1716_v11 }
 0x7d2   : > { %2969 = vmatprep.mubr.msk.bf16.mxu1 %vm3358_vm2, %v3357_v18 }
 0x7d7   : > { %v1809_v14 = vpop.f32.mrb[24].mxu0 }
 0x7d8   : > { %v1810_v15 = vadd.f32 %v1809_v14, %v3830_v20  ;;  %v2965_v16 = vpop.f32.mrb[25].mxu0 }
 0x7d9   : > { %v1812_v17 = vpop.f32.mrb[26].mxu0 }
 0x7da   : > { %v2966_v21 = vpop.f32.mrb[27].mxu0  ;;  %v1818_v22 = vsel %vm1180_vm3, %v1810_v15, -inf }
 0x7db   : > { %1819 = vmax.xlane.f32.xlu1 %v1818_v22 }
 0x7ec   : > { %1887 = vrot.lane.b32.xlu1 %v3802_v7, %s3360_s23 }
 0x7f0   : > { %1989 = vrot.lane.b32.xlu1 %v3788_v56, %s3361_s0 }
 0x7f4   : > { %2039 = vrot.lane.b32.xlu1 %v3790_v61, %s3361_s0 }
 0x7f8   : > { %2037 = vrot.lane.b32.xlu1 %v3804_v8, %s3361_s0 }
 0x868   : > { %v1820_v23 = vpop.xlane.xlu1 %1819 }
 0x869   : > { %v1822_v26 = vsub.f32 %v1810_v15, %v1820_v23 }
 0x86b   : > { %v1825_v27 = vmul.f32 1.442695, %v1822_v26 }
 0x86c   : > { %v1888_v24 = vpop.permute.xlu1 %1887 }
 0x86d   : > { %v1893_v25 = vsel %vm1300_vm4, %v1888_v24, 0  ;;  %3156 = vpow2.f32 %v1825_v27 }
 0x86e   : > { %2974 = vmatpush3.bf16.msra.mxu0 %v1893_v25 }
 0x86f   : > { %2985 = vmatprep.subr.bf16.mxu0 %v3357_v18 }
 0x870   : > { %v1990_v47 = vpop.permute.xlu1 %1989 }
 0x871   : > { %v1995_v49 = vsel %vm1180_vm3, %v1990_v47, 0 }
 0x877   : > { %v3157_v37 = vpop.eup %3156 }
 0x878   : > { %v1830_v38 = vsel %vm1180_vm3, %v3157_v37, 0.0 }
 0x89c   : > { %v1661_v28 = vpop.f32.mrb[24].mxu1 }
 0x89d   : > { %v3933_v29 = vadd.f32 %v1708_v9, %v1661_v28  ;;  %v2947_v30 = vpop.f32.mrb[25].mxu1 }
 0x89e   : > { %v1664_v56 = vpop.f32.mrb[26].mxu1 }
 0x89f   : > { %v3935_v31 = vadd.f32 %v1711_v12, %v1664_v56  ;;  %v2948_v61 = vpop.f32.mrb[27].mxu1  ;;  %v2040_v12 = vpop.permute.xlu1 %2039 }
 0x8a0   : > { %v2045_v17 = vsel %vm1180_vm3, %v2040_v12, 0 }
 0x8a4   : > { %v1759_v32 = vpop.f32.mrb[28].mxu1 }
 0x8a5   : > { %v1760_v8 = vadd.f32 %v1759_v32, %v3828_v19  ;;  %v2959_v33 = vpop.f32.mrb[29].mxu1 }
 0x8a6   : > { %v1762_v34 = vpop.f32.mrb[30].mxu1 }
 0x8a7   : > { %v2960_v35 = vpop.f32.mrb[31].mxu1  ;;  %v1815_v36 = vsel %vm1180_vm3, %v1760_v8, -inf }
 0x8a8   : > { %1816 = vmax.xlane.f32.xlu0 %v1815_v36 }
 0x8ac   : > { %1831 = vadd.xlane.f32.xlu0 %v1830_v38 }
 0x935   : > { %v1817_v39 = vpop.xlane.xlu0 %1816 }
 0x936   : > { %v1821_v40 = vsub.f32 %v1760_v8, %v1817_v39 }
 0x938   : > { %v1823_v41 = vmul.f32 1.442695, %v1821_v40 }
 0x939   : > { %v1832_v42 = vpop.xlane.xlu0 %1831 }
 0x93a   : > { %3158 = vpow2.f32 %v1823_v41 }
 0x93b   : > { %3160 = vrcp.f32 %v1832_v42 }
 0x944   : > { %v3159_v43 = vpop.eup %3158 }
 0x945   : > { %v3161_v44 = vpop.eup %3160  ;;  %v1827_v45 = vsel %vm1180_vm3, %v3159_v43, 0.0 }
 0x946   : > { %v1836_v46 = vmul.f32 %v3161_v44, %v3157_v37  ;;  %1828 = vadd.xlane.f32.xlu0 %v1827_v45 }
 0x948   : > { %v1838_v48 = vpack.c.bf16 %v1836_v46, %v1836_v46 }
 0x94a   : > { %2976 = vmatmul.mubr.msk.bf16.vlgmr.msra.gmra.mrb[28].mxu0 %vm1180_vm3, %v1838_v48 }
 0x94b   : > { %2986 = vmatpush3.bf16.xpose.msra.mxu0 %v1995_v49  ;;  %2987 = vmatprep.mubr.msk.bf16.mxu0 %vm3358_vm2, %v3357_v18 }
 0x94c   : > { %2997 = vmatprep.subr.bf16.mxu0 %v3357_v18 }
 0x95c   : > { %1839 = vrot.lane.b32.xlu0 %v3797_v4, %s3360_s23 }
 0x960   : > { %1987 = vrot.lane.b32.xlu0 %v3800_v6, %s3361_s0 }
 0x9d3   : > { %v1829_v50 = vpop.xlane.xlu0 %1828 }
 0x9d4   : > { %3162 = vrcp.f32 %v1829_v50  ;;  %v2789_v50 = vld [vmem:[%s4181_s26 + $0xc] sm:$0xf] }
 0x9d7   : > { %v1840_v51 = vpop.permute.xlu0 %1839 }
 0x9d8   : > { %v1845_v52 = vsel %vm1300_vm4, %v1840_v51, 0  ;;  %v2214_v51 = vsel %vm1300_vm4, %v2789_v50, 0 }
 0x9d9   : > { %2968 = vmatpush3.bf16.msra.mxu1 %v1845_v52 }
 0x9da   : > { %2979 = vmatprep.subr.bf16.mxu1 %v3357_v18 }
 0x9db   : > { %v1988_v53 = vpop.permute.xlu0 %1987 }
 0x9dc   : > { %2988 = vmatmul.mubr.msk.bf16.vlgmr.msra.gmra.mrb[32].mxu0 %vm1180_vm3, %v1988_v53 }
 0x9dd   : > { %2999 = vmatprep.mubr.msk.bf16.mxu0 %vm3358_vm2, %v3357_v18 }
 0x9de   : > { %v3163_v54 = vpop.eup %3162 }
 0x9df   : > { %v1835_v55 = vmul.f32 %v3163_v54, %v3159_v43 }
 0x9e1   : > { %v1837_v57 = vpack.c.bf16 %v1835_v55, %v1835_v55 }
 0x9e3   : > { %2970 = vmatmul.mubr.msk.bf16.vlgmr.msra.gmra.mrb[32].mxu1 %vm1180_vm3, %v1837_v57 }
 0x9e4   : > { %2981 = vmatprep.mubr.msk.bf16.mxu1 %vm3358_vm2, %v3357_v18  ;;  %2980 = vmatpush3.bf16.msra.mxu1 %v1942_v63 }
 0x9e5   : > { %2991 = vmatprep.subr.bf16.mxu1 %v3357_v18 }
 0xa1d   : > { %v1929_v6 = vpop.f32.mrb[28].mxu0 }
 0xa1e   : > { %v2977_v59 = vpop.f32.mrb[29].mxu0 }
 0xa1f   : > { %v1932_v58 = vpop.f32.mrb[30].mxu0 }
 0xa20   : > { %v2978_v60 = vpop.f32.mrb[31].mxu0 }
 0xaaf   : > { %v2031_v0 = vpop.f32.mrb[32].mxu0 }
 0xab0   : > { %v2032_v1 = vadd.f32 %v2031_v0, %v3828_v19  ;;  %v2989_v5 = vpop.f32.mrb[33].mxu0  ;;  %v2038_v19 = vpop.permute.xlu1 %2037 }
 0xab1   : > { %v2034_v9 = vpop.f32.mrb[34].mxu0 }
 0xab2   : > { %v2990_v10 = vpop.f32.mrb[35].mxu0  ;;  %v2087_v11 = vsel %vm1180_vm3, %v2032_v1, -inf }
 0xab3   : > { %2088 = vmax.xlane.f32.xlu0 %v2087_v11 }
 0xab6   : > { %v1881_v13 = vpop.f32.mrb[32].mxu1 }
 0xab7   : > { %v1935_v14 = vpack.c.bf16 %v1929_v6, %v1881_v13  ;;  %v2971_v15 = vpop.f32.mrb[33].mxu1 }
 0xab8   : > { %v1884_v16 = vpop.f32.mrb[34].mxu1 }
 0xab9   : > { %v2972_v21 = vpop.f32.mrb[35].mxu1  ;;  %2982 = vmatmul.mubr.msk.bf16.vlgmr.msra.gmra.mrb[36].mxu1 %vm1180_vm3, %v1935_v14 }
 0xaba   : > { %2992 = vmatpush3.bf16.xpose.msra.mxu1 %v2045_v17  ;;  %2993 = vmatprep.mubr.msk.bf16.mxu1 %vm3358_vm2, %v3357_v18 }
 0xabb   : > { %3003 = vmatprep.subr.bf16.mxu1 %v3357_v18 }
 0xac1   : > { %2994 = vmatmul.mubr.msk.bf16.vlgmr.msra.gmra.mrb[40].mxu1 %vm1180_vm3, %v2038_v19 }
 0xac2   : > { %3005 = vmatprep.mubr.msk.bf16.mxu1 %vm3358_vm2, %v3357_v18 }
 0xb40   : > { %v2089_v22 = vpop.xlane.xlu0 %2088 }
 0xb41   : > { %v2093_v23 = vsub.f32 %v2032_v1, %v2089_v22  ;;  %v2791_v1 = vld [vmem:[%s4183_s27] ss:$0 sm:$0xff] }
 0xb43   : > { %v2095_v24 = vmul.f32 1.442695, %v2093_v23 }
 0xb45   : > { %3164 = vpow2.f32 %v2095_v24 }
 0xb4f   : > { %v3165_v25 = vpop.eup %3164 }
 0xb50   : > { %v2099_v26 = vsel %vm1180_vm3, %v3165_v25, 0.0 }
 0xb51   : > { %2100 = vadd.xlane.f32.xlu0 %v2099_v26 }
 0xb8c   : > { %v1978_v27 = vpop.f32.mrb[36].mxu1 }
 0xb8d   : > { %v1985_v28 = vadd.f32 %v1978_v27, %v3933_v29  ;;  %v2983_v30 = vpop.f32.mrb[37].mxu1  ;;  %v3130_v27 = vld [vmem:[%s736_s29] sm:$0xff]  }
 0xb8e   : > { %v1981_v56 = vpop.f32.mrb[38].mxu1  ;;  %v3132_v30 = vld [vmem:[%s3716_s4] sm:$0xff]  }
 0xb8f   : > { %v1986_v61 = vadd.f32 %v1981_v56, %v3935_v31  ;;  %v2984_v32 = vpop.f32.mrb[39].mxu1  ;;  %v3133_v56 = vld [vmem:[%s3716_s4 + $0x8] sm:$0xff]  }
 0xb94   : > { %v2081_v8 = vpop.f32.mrb[40].mxu1 }
 0xb95   : > { %v2082_v33 = vadd.f32 %v2081_v8, %v3830_v20  ;;  %v2995_v34 = vpop.f32.mrb[41].mxu1 }
 0xb96   : > { %v2084_v35 = vpop.f32.mrb[42].mxu1 }
 0xb97   : > { %v2996_v36 = vpop.f32.mrb[43].mxu1  ;;  %v2090_v37 = vsel %vm1180_vm3, %v2082_v33, -inf }
 0xb98   : > { %2091 = vmax.xlane.f32.xlu1 %v2090_v37  ;;  %v2792_v37 = vld [vmem:[%s884_s17] ss:$0 sm:$0xff] }
 0xba9   : > { %2159 = vrot.lane.b32.xlu1 %v3802_v7, %s3361_s0 }
 0xbde   : > { %v2101_v42 = vpop.xlane.xlu0 %2100 }
 0xc25   : > { %v2092_v38 = vpop.xlane.xlu1 %2091 }
 0xc26   : > { %v2094_v39 = vsub.f32 %v2082_v33, %v2092_v38 }
 0xc28   : > { %v2097_v29 = vmul.f32 1.442695, %v2094_v39 }
 0xc29   : > { %v2160_v40 = vpop.permute.xlu1 %2159 }
 0xc2a   : > { %3166 = vpow2.f32 %v2097_v29  ;;  %v2165_v31 = vsel %vm1300_vm4, %v2160_v40, 0 }
 0xc2b   : > { %3004 = vmatpush3.bf16.msra.mxu1 %v2165_v31  ;;  %3168 = vrcp.f32 %v2101_v42  ;;  %v2793_v31 = vld [vmem:[%s887_s21] ss:$0 sm:$0xff]  ;;  %s4185_s21 = sld [smem:[#allocation18_spill]] }
 0xc2c   : > { %3015 = vmatprep.subr.bf16.mxu1 %v3357_v18 }
 0xc31   : > { %p3061_p1 = scmp.eq.s32.totalorder %s4185_s21, 1 }
 0xc34   : > { %v3167_v20 = vpop.eup %3166 }
 0xc35   : > { %v2102_v41 = vsel %vm1180_vm3, %v3167_v20, 0.0  ;;  %v3169_v7 = vpop.eup %3168 }
 0xc36   : > { %2103 = vadd.xlane.f32.xlu0 %v2102_v41  ;;  %v2107_v44 = vmul.f32 %v3169_v7, %v3165_v25 }
 0xc38   : > { %v2109_v47 = vpack.c.bf16 %v2107_v44, %v2107_v44  ;;  %v3135_v44 = vld [vmem:[%s3716_s4 + $0x18] sm:$0xff]  }
 0xc4c   : > { %2111 = vrot.lane.b32.xlu0 %v3797_v4, %s3361_s0 }
 0xcc3   : > { %v2104_v43 = vpop.xlane.xlu0 %2103 }
 0xcc4   : > { %3170 = vrcp.f32 %v2104_v43  ;;  %v3134_v43 = vld [vmem:[%s3716_s4 + $0x10] sm:$0xff]  }
 0xcc7   : > { %v2112_v45 = vpop.permute.xlu0 %2111 }
 0xcc8   : > { %v2117_v46 = vsel %vm1300_vm4, %v2112_v45, 0  ;;  %v2794_v45 = vld [vmem:[%s890_s2] ss:$0 sm:$0xff]  ;;  %s3362_s2 = smov [#allocation8]  }
 0xcc9   : > { %2998 = vmatpush3.bf16.msra.mxu0 %v2117_v46  ;;  %s2482_s30 = sshll.u32 %s3362_s2, 4  ;;  %s2483_s30 = int_to_ptr.vmem [resolvable:$true] %s2482_s30 }
 0xcca   : > { %3009 = vmatprep.subr.bf16.mxu0 %v3357_v18  ;;  %p3271_p9 = scmp.lt.s32.totalorder %s2483_s30, %s2483_s30 }
 0xccc   : > { %3000 = vmatmul.mubr.msk.bf16.vlgmr.msra.gmra.mrb[36].mxu0 %vm1180_vm3, %v2109_v47 }
 0xccd   : > { %3011 = vmatprep.mubr.msk.bf16.mxu0 %vm3358_vm2, %v3357_v18  ;;  %3010 = vmatpush3.bf16.msra.mxu0 %v2214_v51 }
 0xcce   : > { %v3171_v4 = vpop.eup %3170  ;;  %3023 = vmatprep.subr.bf16.mxu0 %v3357_v18 }
 0xccf   : > { %v2108_v48 = vmul.f32 %v3171_v4, %v3167_v20 }
 0xcd1   : > { %v2110_v49 = vpack.c.bf16 %v2108_v48, %v2108_v48 }
 0xcd3   : > { %3006 = vmatmul.mubr.msk.bf16.vlgmr.msra.gmra.mrb[44].mxu1 %vm1180_vm3, %v2110_v49 }
 0xcd4   : > { %3019 = vmatprep.mubr.msk.bf16.mxu1 %vm3358_vm2, %v3357_v18  ;;  %3016 = vmatpush3.bf16.msra.mxu1 %v3130_v27 }
 0xcd5   : > { %3017 = vmatprep.subr.bf16.mxu1 %v3357_v18 }
 0xd9f   : > { %v2153_v52 = vpop.f32.mrb[36].mxu0 }
 0xda0   : > { %v3001_v53 = vpop.f32.mrb[37].mxu0 }
 0xda1   : > { %v2156_v54 = vpop.f32.mrb[38].mxu0 }
 0xda2   : > { %v3002_v55 = vpop.f32.mrb[39].mxu0 }
 0xda6   : > { %v2201_v57 = vpop.f32.mrb[44].mxu1 }
 0xda7   : > { %v2207_v6 = vpack.c.bf16 %v2201_v57, %v2153_v52  ;;  %v3007_v59 = vpop.f32.mrb[45].mxu1 }
 0xda8   : > { %v2204_v58 = vpop.f32.mrb[46].mxu1 }
 0xda9   : > { %v3008_v60 = vpop.f32.mrb[47].mxu1  ;;  %3012 = vmatmul.mubr.msk.bf16.vlgmr.msra.gmra.mrb[40].mxu0 %vm1180_vm3, %v2207_v6 }
 0xdaa   : > { %3031 = vmatprep.mubr.msk.bf16.mxu0 %vm3358_vm2, %v3357_v18  ;;  %3024 = vmatpush3.bf16.msra.mxu0 %v3132_v30 }
 0xdab   : > { %3025 = vmatprep.subr.bf16.mxu0 %v3357_v18 }
 0xdae   : > { %3026 = vmatpush3.bf16.msra.mxu0 %v3133_v56 }
 0xdaf   : > { %3027 = vmatprep.subr.bf16.mxu0 %v3357_v18 }
 0xdb2   : > { %3028 = vmatpush3.bf16.msra.mxu0 %v3134_v43 }
 0xdb3   : > { %3029 = vmatprep.subr.bf16.mxu0 %v3357_v18  ;;  %v2798_v18 = vld [vmem:[%s898_s7] ss:$0 sm:$0xff]  ;;  %s3264_s7 = scalar_lea.vmem %s2483_s30, 256 }
 0xdb4   : > { %p3265_p6 = scmp.ne.s32.totalorder %s2483_s30, %s3264_s7  ;;  %p3272_p12 = scmp.lt.s32.totalorder %s3264_s7, %s3264_s7 }
 0xdb6   : > { %3030 = vmatpush3.bf16.msra.mxu0 %v3135_v44  ;;  %p3266_p4 = pnand %p3265_p6, %p3061_p1  ;;  %p3273_p10 = por %p3272_p12, %p3271_p9 }
 0xdb8   : > { %p3267_p7 = pneg %p3266_p4 }
 0xdba   : > { %p3274_p0 = pnand %p3273_p10, %p3267_p7 }
 0xe7c   : > { %v2250_v62 = vpop.f32.mrb[40].mxu0 }
 0xe7d   : > { %v2257_v63 = vadd.f32 %v2250_v62, %v1985_v28  ;;  %v3013_v0 = vpop.f32.mrb[41].mxu0  ;;  %v3131_v28 = vld [vmem:[%s736_s29 + $0x8] sm:$0xff]  }
 0xe7e   : > { %v2253_v5 = vpop.f32.mrb[42].mxu0  ;;  %3018 = vmatpush3.bf16.msra.mxu1 %v3131_v28 }
 0xe7f   : > { %v2259_v9 = vadd.f32 %v2257_v63, %v3724_v2  ;;  %v2258_v10 = vadd.f32 %v2253_v5, %v1986_v61  ;;  %v3014_v11 = vpop.f32.mrb[43].mxu0 }
 0xe81   : > { %v4003_v12 = vadd.f32 %v2791_v1, %v2259_v9  ;;  %v2260_v13 = vadd.f32 %v2258_v10, %v3726_v3 }
 0xe83   : > { %v4006_v14 = vadd.f32 %v2791_v1, %v2260_v13  ;;  %v2272_v15 = vsel %vm920_vm1, %v4003_v12, 0.0 }
 0xe84   : > { %2273 = vadd.xlane.f32.xlu1 %v2272_v15 }
 0xe85   : > { %v2275_v16 = vsel %vm920_vm1, %v4006_v14, 0.0 }
 0xe86   : > { %2276 = vadd.xlane.f32.xlu0 %v2275_v16 }
 0xf11   : > { %v2274_v17 = vpop.xlane.xlu1 %2273 }
 0xf12   : > { %v2278_v2 = vmul.f32 0.03125, %v2274_v17 }
 0xf13   : > { %v2277_v21 = vpop.xlane.xlu0 %2276 }
 0xf14   : > { %v2280_v19 = vsub.f32 %v4003_v12, %v2278_v2  ;;  %v2279_v3 = vmul.f32 0.03125, %v2277_v21 }
 0xf16   : > { %v2281_v22 = vsub.f32 %v4006_v14, %v2279_v3  ;;  %v2282_v23 = vmul.f32 %v2280_v19, %v2280_v19 }
 0xf18   : > { %v2284_v24 = vsel %vm920_vm1, %v2282_v23, 0.0  ;;  %v2283_v25 = vmul.f32 %v2281_v22, %v2281_v22 }
 0xf19   : > { %2285 = vadd.xlane.f32.xlu0 %v2284_v24 }
 0xf1a   : > { %v2287_v26 = vsel %vm920_vm1, %v2283_v25, 0.0 }
 0xf1b   : > { %2288 = vadd.xlane.f32.xlu1 %v2287_v26 }
 0xfa6   : > { %v2286_v61 = vpop.xlane.xlu0 %2285 }
 0xfa7   : > { %v2290_v32 = vmul.f32 0.03125, %v2286_v61 }
 0xfa8   : > { %v2289_v8 = vpop.xlane.xlu1 %2288 }
 0xfa9   : > { %v2292_v33 = vadd.f32 1e-05, %v2290_v32  ;;  %v2291_v34 = vmul.f32 0.03125, %v2289_v8 }
 0xfab   : > { %3172 = vrsqrt.f32 %v2292_v33  ;;  %v2293_v35 = vadd.f32 1e-05, %v2291_v34 }
 0xfad   : > { %3174 = vrsqrt.f32 %v2293_v35 }
 0xfb5   : > { %v3173_v36 = vpop.eup %3172 }
 0xfb6   : > { %v2296_v38 = vmul.f32 %v3173_v36, %v2280_v19 }
 0xfb7   : > { %v3175_v39 = vpop.eup %3174 }
 0xfb8   : > { %v2304_v29 = vmul.f32 %v2792_v37, %v2296_v38  ;;  %v2297_v40 = vmul.f32 %v3175_v39, %v2281_v22 }
 0xfba   : > { %v2305_v20 = vmul.f32 %v2792_v37, %v2297_v40  ;;  %v2312_v41 = vadd.f32 %v2793_v31, %v2304_v29 }
 0xfbc   : > { %v2313_v42 = vadd.f32 %v2793_v31, %v2305_v20 }
 0xfbe   : > { %v2314_v7 = vpack.c.bf16 %v2313_v42, %v2312_v41 }
 0xfc0   : > { %3020 = vmatmul.mubr.msk.bf16.vlgmr.msra.gmra.mrb[48].mxu1 %vm920_vm1, %v2314_v7 }
0x1093   : > { %v2375_v46 = vpop.f32.mrb[48].mxu1 }
0x1094   : > { %v2376_v47 = vadd.f32 %v2794_v45, %v2375_v46  ;;  %v3021_v4 = vpop.f32.mrb[49].mxu1 }
0x1095   : > { %v2378_v48 = vpop.f32.mrb[50].mxu1 }
0x1096   : > { %v2379_v49 = vadd.f32 %v2794_v45, %v2378_v48  ;;  %v3022_v50 = vpop.f32.mrb[51].mxu1  ;;  %v2382_v51 = vmax.f32 %v2376_v47, 0.0 }
0x1098   : > { %v2383_v52 = vmax.f32 %v2379_v49, 0.0 }
0x109a   : > { %v2384_v53 = vpack.c.bf16 %v2383_v52, %v2382_v51 }
0x109c   : > { %3032 = vmatmul.mubr.msk.bf16.vlgmr.msra.gmra.mrb[44].mxu0 %vm2424_vm7, %v2384_v53 }
0x116f   : > { %v2462_v54 = vpop.f32.mrb[44].mxu0 }
0x1170   : > { %v2463_v55 = vadd.f32 %v2798_v18, %v2462_v54  ;;  %v3033_v57 = vpop.f32.mrb[45].mxu0 }
0x1171   : > { %v2465_v6 = vpop.f32.mrb[46].mxu0 }
0x1172   : > { %v2469_v59 = vadd.f32 %v2463_v55, %v4003_v12  ;;  %v2466_v58 = vadd.f32 %v2798_v18, %v2465_v6  ;;  %v3034_v60 = vpop.f32.mrb[47].mxu0 }
0x1174   : > { %2471 = vst.msk [vmem:[#allocation8] sm:$0xff] %vm920_vm1, %v2469_v59  ;;  %v2470_v62 = vadd.f32 %v2466_v58, %v4006_v14 }
0x1176   : > { %2472 = vst.msk [vmem:[#allocation8 + $0x8] sm:$0xff] %vm920_vm1, %v2470_v62 }
0x1177   : > { %3277 = shalt.err (!%p3274_p0)
}
0x1178   : > { %s4187_s14 = sld [smem:[#allocation32_spill]] }
0x117e   : > { %s3278_s23 = scalar_lea.hbm %s4187_s14, 256 }
0x117f   : > { %p3279_p8 = scmp.ne.s32.totalorder %s4187_s14, %s3278_s23  ;;  %p3284_p5 = scmp.lt.u32.totalorder %s3278_s23, %s4187_s14 }
0x1181   : > { %p3280_p13 = pnand %p3279_p8, %p3061_p1 }
0x1183   : > { %p3281_p2 = pneg %p3280_p13 }
0x1185   : > { %p3286_p3 = pnand %p3284_p5, %p3281_p2 }
0x1187   : > { %3289 = shalt.err (!%p3286_p3)
}
0x1188   : > { %s3363_s18 = smov 128   ;;  %s3364_s27 = smov 8  }
0x1189   : > { %3044 = dma.vmem_to_hbm [thread:$0]  (%p3061_p1), %s2483_s30, 256, %s4187_s14, [#allocation4], %s3363_s18, %s3363_s18, %s3364_s27  }
0x118a   : > { %3323 = dma.done.wait (%p3061_p1), [#allocation4], 256  }
0x118b   : > { %3325 = vsyncadd (%p3061_p1), [#allocation4], 4294967040 }
0x118c PF: > { %s4188_s1 = sld [smem:[#allocation15_spill]]  ;;  %s4189_s27 = sld [smem:[#allocation12_spill]] }
0x118d   : > { %s4190_s28 = sld [smem:[#allocation13_spill]]  ;;  %s4191_s29 = sld [smem:[#allocation17_spill]] }
0x118e   : > { %s4192_s30 = sld [smem:[#allocation14_spill]]  ;;  %s4193_s0 = sld [smem:[#allocation16_spill]] }
0x1192   : > { %s33_s19 = sadd.s32 1, %s4188_s1  }
0x1193   : > { %p30_p11 = scmp.ge.s32.totalorder %s33_s19, 4  }
0x1195   :  { %32 = sbr.rel (!%p30_p11) target bundleno = 20 (0x14), region = 199 }
0x119c   :  { %2498 = vsyncpa [#allocation3], 1 }
0x119d   :  { %2500 = vsyncpa [#allocation3 + $0x1], 1 }
0x119e   :  { %2501 = vsyncpa [#allocation6], 1 }
0x119f   :  { %2503 = vsyncpa [#allocation6 + $0x1], 1 }
0x11a0   :  { %2504 = vsyncpa [#allocation4], 1 }
0x11a1   :  { %2506 = vsyncpa [#allocation4 + $0x1], 1 }

</bundles_post_ra>
